<compile_context>
chip_gen: v7x
topology: tpu7x:2x2x1
jax: 0.10.0
libtpu: 0.0.40
codegen_flags: <defaults>
</compile_context>

<pallas_src>
import jax
import jax.numpy as jnp
from jax.experimental import pallas as pl
from jax.experimental.pallas import tpu as pltpu

_CHUNK_ROWS = 128  # rows processed per inner chunk (bounds vreg pressure)


def _round_up(x: int, m: int) -> int:
    return ((x + m - 1) // m) * m


def _encoder_kernel(idx_ref, wtab_ref, o_ref):
    # idx_ref : (TM, L)    int32   token ids for this tile of rows
    # wtab_ref: (L, V, D)  float32 positionally weighted table f[l]*E
    # o_ref   : (TM, D)    float32 encoded sentences
    TM, L = idx_ref.shape
    _, V, D = wtab_ref.shape
    TC = min(TM, _CHUNK_ROWS)        # rows per inner chunk
    n_chunks = TM // TC              # wrapper guarantees TM % TC == 0

    def chunk(c, carry):
        r0 = pl.multiple_of(c * TC, TC)
        idx_c = idx_ref[pl.ds(r0, TC), :]                          # (TC, L)
        col = jax.lax.broadcasted_iota(jnp.int32, (TC, V), 1)      # (TC, V)
        acc = jnp.zeros((TC, D), jnp.float32)
        for l in range(L):                                         # static unroll
            onehot = (idx_c[:, l:l + 1] == col).astype(jnp.float32)  # (TC, V)
            # gather + f-weighting + accumulate-over-L, all on the MXU.
            acc = acc + jnp.dot(
                onehot, wtab_ref[l],
                precision=jax.lax.Precision.HIGHEST,
                preferred_element_type=jnp.float32)
        o_ref[pl.ds(r0, TC), :] = acc
        return carry

    jax.lax.fori_loop(0, n_chunks, chunk, 0)


def input_encoder_forward(input_sequence, embedding_table, f_full, *, block_rows=512):
    """
    input_sequence : int32   (B, N, L)
    embedding_table: float32 (V, D)
    f_full         : float32 (max_seq_len, D), only f_full[:L] is used
    returns        : float32 (B, N, D)
    """
    B, N, L = input_sequence.shape
    V, D = embedding_table.shape
    BN = B * N

    # Weights-only precompute: fold positional weights into the table.
    wtab = (f_full[:L, :][:, None, :] *
            embedding_table[None, :, :]).astype(jnp.float32)       # (L, V, D)

    idx = input_sequence.reshape(BN, L).astype(jnp.int32)

    # Row tile: large to amortize per-grid-step overhead, and a multiple of the
    # in-kernel chunk size.  (On v7x, pick block_rows so the grid keeps >=4
    # steps if BN is large enough - the parallel axis shards across the 2 TCs.)
    if BN <= _CHUNK_ROWS:
        tm = _round_up(BN, 8)
    else:
        tm = min(_round_up(BN, _CHUNK_ROWS), _round_up(block_rows, _CHUNK_ROWS))

    BN_pad = _round_up(BN, tm)
    if BN_pad != BN:
        # Pad rows reference token 0 (always valid); results are sliced off.
        idx = jnp.pad(idx, ((0, BN_pad - BN), (0, 0)))

    grid = (BN_pad // tm,)

    out = pl.pallas_call(
        _encoder_kernel,
        out_shape=jax.ShapeDtypeStruct((BN_pad, D), jnp.float32),
        grid_spec=pltpu.PrefetchScalarGridSpec(
            num_scalar_prefetch=0,
            grid=grid,
            in_specs=[
                pl.BlockSpec((tm, L), lambda i: (i, 0)),        # token ids
                pl.BlockSpec((L, V, D), lambda i: (0, 0, 0)),   # resident table
            ],
            out_specs=pl.BlockSpec((tm, D), lambda i: (i, 0)),
        ),
        compiler_params=pltpu.CompilerParams(
            dimension_semantics=("parallel",),
        ),
    )(idx, wtab)

    return out[:BN].reshape(B, N, D)


def reference_forward(input_sequence, embedding_table, f_full):
    B, N, L = input_sequence.shape
    D = embedding_table.shape[1]
    e = jnp.take(embedding_table, input_sequence.reshape(-1), axis=0)
    e = e.reshape(B, N, L, D)
    return (f_full[:L, :] * e).sum(axis=2)


if __name__ == "__main__":
    vocabulary_size = 50
    embedding_dim = 32          # D
    max_sequence_length = 10

    key = jax.random.PRNGKey(0)
    k_emb, k_f, k_idx1, k_idx2 = jax.random.split(key, 4)

    # nn.Embedding default init: N(0, 1)
    embedding_table = jax.random.normal(
        k_emb, (vocabulary_size, embedding_dim), dtype=jnp.float32)

    # xavier_normal_ on f.
    xavier_std = (2.0 / (max_sequence_length + embedding_dim)) ** 0.5
    f_full = xavier_std * jax.random.normal(
        k_f, (max_sequence_length, embedding_dim), dtype=jnp.float32)

    # Primary small case: (B, N, L) = (2, 4, 8).
    B, N, L = 2, 4, 8
    input_sequence = jax.random.randint(
        k_idx1, (B, N, L), 0, vocabulary_size, dtype=jnp.int32)
    out = jax.block_until_ready(
        input_encoder_forward(input_sequence, embedding_table, f_full))
    ref = reference_forward(input_sequence, embedding_table, f_full)
    assert out.shape == (B, N, embedding_dim)
    assert jnp.allclose(out, ref, atol=1e-4, rtol=1e-4), "mismatch (primary)"

    # Ragged case: BN not a multiple of the row tile and L != 8 -> exercises
    # the padding path and the general-L loop.
    B2, N2, L2 = 3, 5, 7
    input_sequence2 = jax.random.randint(
        k_idx2, (B2, N2, L2), 0, vocabulary_size, dtype=jnp.int32)
    out2 = jax.block_until_ready(
        input_encoder_forward(input_sequence2, embedding_table, f_full))
    ref2 = reference_forward(input_sequence2, embedding_table, f_full)
    assert out2.shape == (B2, N2, embedding_dim)
    assert jnp.allclose(out2, ref2, atol=1e-4, rtol=1e-4), "mismatch (ragged)"

    print("KERNEL_OK")
</pallas_src>

<mosaic_0001>
module attributes {stable_mosaic.version = 11 : i64} {
  func.func @_encoder_kernel(%arg0: i32, %arg1: memref<8x8xi32, #tpu.memory_space<vmem>>, %arg2: memref<8x50x32xf32, #tpu.memory_space<vmem>>, %arg3: memref<8x32xf32, #tpu.memory_space<vmem>>) attributes {dimension_semantics = [#tpu.dimension_semantics<parallel>], iteration_bounds = array<i64: 1>, scalar_prefetch = 0 : i64, scratch_operands = 0 : i64, tpu.core_type = #tpu.core_type<tc>, window_params = [{transform_indices = @transform_0, window_bounds = array<i64: 8, 8>}, {pipeline_mode = #tpu.pipeline_mode<synchronous>, transform_indices = @transform_1, window_bounds = array<i64: 8, 50, 32>}, {transform_indices = @transform_2, window_bounds = array<i64: 8, 32>}]} {
    %c0_i32 = arith.constant 0 : i32
    %c8_i32 = arith.constant 8 : i32
    %0 = arith.muli %c0_i32, %c8_i32 : i32
    %1 = tpu.assume_multiple %0, 8 : i32
    %2 = arith.index_cast %1 : i32 to index
    %c0 = arith.constant 0 : index
    %3 = vector.load %arg1[%2, %c0] : memref<8x8xi32, #tpu.memory_space<vmem>>, vector<8x8xi32>
    %4 = tpu.iota {dimensions = array<i32: 1>} : vector<8x50xi32>
    %cst = arith.constant 0.000000e+00 : f32
    %5 = vector.broadcast %cst : f32 to vector<8x32xf32>
    %6 = vector.extract_strided_slice %3 {offsets = [0, 0], sizes = [8, 1], strides = [1, 1]} : vector<8x8xi32> to vector<8x1xi32>
    %7 = vector.broadcast %6 : vector<8x1xi32> to vector<8x50xi32>
    %8 = arith.cmpi eq, %7, %4 : vector<8x50xi32>
    %9 = arith.extui %8 : vector<8x50xi1> to vector<8x50xi32>
    %10 = arith.sitofp %9 : vector<8x50xi32> to vector<8x50xf32>
    %c0_0 = arith.constant 0 : index
    %c0_1 = arith.constant 0 : index
    %c0_2 = arith.constant 0 : index
    %11 = vector.load %arg2[%c0_0, %c0_1, %c0_2] : memref<8x50x32xf32, #tpu.memory_space<vmem>>, vector<1x50x32xf32>
    %12 = vector.shape_cast %11 : vector<1x50x32xf32> to vector<50x32xf32>
    %cst_3 = arith.constant dense<0.000000e+00> : vector<8x32xf32>
    %13 = tpu.matmul %10, %12, %cst_3 {dimension_numbers = #tpu.dot_dimension_numbers<[1], [0], [0], [1], [0, 0, 1, 1], [], []>, precision = #tpu.contract_precision<fp32>} : vector<8x50xf32>, vector<50x32xf32>, vector<8x32xf32> -> vector<8x32xf32>
    %14 = arith.addf %5, %13 : vector<8x32xf32>
    %15 = vector.extract_strided_slice %3 {offsets = [0, 1], sizes = [8, 1], strides = [1, 1]} : vector<8x8xi32> to vector<8x1xi32>
    %16 = vector.broadcast %15 : vector<8x1xi32> to vector<8x50xi32>
    %17 = arith.cmpi eq, %16, %4 : vector<8x50xi32>
    %18 = arith.extui %17 : vector<8x50xi1> to vector<8x50xi32>
    %19 = arith.sitofp %18 : vector<8x50xi32> to vector<8x50xf32>
    %c1 = arith.constant 1 : index
    %c0_4 = arith.constant 0 : index
    %c0_5 = arith.constant 0 : index
    %20 = vector.load %arg2[%c1, %c0_4, %c0_5] : memref<8x50x32xf32, #tpu.memory_space<vmem>>, vector<1x50x32xf32>
    %21 = vector.shape_cast %20 : vector<1x50x32xf32> to vector<50x32xf32>
    %cst_6 = arith.constant dense<0.000000e+00> : vector<8x32xf32>
    %22 = tpu.matmul %19, %21, %cst_6 {dimension_numbers = #tpu.dot_dimension_numbers<[1], [0], [0], [1], [0, 0, 1, 1], [], []>, precision = #tpu.contract_precision<fp32>} : vector<8x50xf32>, vector<50x32xf32>, vector<8x32xf32> -> vector<8x32xf32>
    %23 = arith.addf %14, %22 : vector<8x32xf32>
    %24 = vector.extract_strided_slice %3 {offsets = [0, 2], sizes = [8, 1], strides = [1, 1]} : vector<8x8xi32> to vector<8x1xi32>
    %25 = vector.broadcast %24 : vector<8x1xi32> to vector<8x50xi32>
    %26 = arith.cmpi eq, %25, %4 : vector<8x50xi32>
    %27 = arith.extui %26 : vector<8x50xi1> to vector<8x50xi32>
    %28 = arith.sitofp %27 : vector<8x50xi32> to vector<8x50xf32>
    %c2 = arith.constant 2 : index
    %c0_7 = arith.constant 0 : index
    %c0_8 = arith.constant 0 : index
    %29 = vector.load %arg2[%c2, %c0_7, %c0_8] : memref<8x50x32xf32, #tpu.memory_space<vmem>>, vector<1x50x32xf32>
    %30 = vector.shape_cast %29 : vector<1x50x32xf32> to vector<50x32xf32>
    %cst_9 = arith.constant dense<0.000000e+00> : vector<8x32xf32>
    %31 = tpu.matmul %28, %30, %cst_9 {dimension_numbers = #tpu.dot_dimension_numbers<[1], [0], [0], [1], [0, 0, 1, 1], [], []>, precision = #tpu.contract_precision<fp32>} : vector<8x50xf32>, vector<50x32xf32>, vector<8x32xf32> -> vector<8x32xf32>
    %32 = arith.addf %23, %31 : vector<8x32xf32>
    %33 = vector.extract_strided_slice %3 {offsets = [0, 3], sizes = [8, 1], strides = [1, 1]} : vector<8x8xi32> to vector<8x1xi32>
    %34 = vector.broadcast %33 : vector<8x1xi32> to vector<8x50xi32>
    %35 = arith.cmpi eq, %34, %4 : vector<8x50xi32>
    %36 = arith.extui %35 : vector<8x50xi1> to vector<8x50xi32>
    %37 = arith.sitofp %36 : vector<8x50xi32> to vector<8x50xf32>
    %c3 = arith.constant 3 : index
    %c0_10 = arith.constant 0 : index
    %c0_11 = arith.constant 0 : index
    %38 = vector.load %arg2[%c3, %c0_10, %c0_11] : memref<8x50x32xf32, #tpu.memory_space<vmem>>, vector<1x50x32xf32>
    %39 = vector.shape_cast %38 : vector<1x50x32xf32> to vector<50x32xf32>
    %cst_12 = arith.constant dense<0.000000e+00> : vector<8x32xf32>
    %40 = tpu.matmul %37, %39, %cst_12 {dimension_numbers = #tpu.dot_dimension_numbers<[1], [0], [0], [1], [0, 0, 1, 1], [], []>, precision = #tpu.contract_precision<fp32>} : vector<8x50xf32>, vector<50x32xf32>, vector<8x32xf32> -> vector<8x32xf32>
    %41 = arith.addf %32, %40 : vector<8x32xf32>
    %42 = vector.extract_strided_slice %3 {offsets = [0, 4], sizes = [8, 1], strides = [1, 1]} : vector<8x8xi32> to vector<8x1xi32>
    %43 = vector.broadcast %42 : vector<8x1xi32> to vector<8x50xi32>
    %44 = arith.cmpi eq, %43, %4 : vector<8x50xi32>
    %45 = arith.extui %44 : vector<8x50xi1> to vector<8x50xi32>
    %46 = arith.sitofp %45 : vector<8x50xi32> to vector<8x50xf32>
    %c4 = arith.constant 4 : index
    %c0_13 = arith.constant 0 : index
    %c0_14 = arith.constant 0 : index
    %47 = vector.load %arg2[%c4, %c0_13, %c0_14] : memref<8x50x32xf32, #tpu.memory_space<vmem>>, vector<1x50x32xf32>
    %48 = vector.shape_cast %47 : vector<1x50x32xf32> to vector<50x32xf32>
    %cst_15 = arith.constant dense<0.000000e+00> : vector<8x32xf32>
    %49 = tpu.matmul %46, %48, %cst_15 {dimension_numbers = #tpu.dot_dimension_numbers<[1], [0], [0], [1], [0, 0, 1, 1], [], []>, precision = #tpu.contract_precision<fp32>} : vector<8x50xf32>, vector<50x32xf32>, vector<8x32xf32> -> vector<8x32xf32>
    %50 = arith.addf %41, %49 : vector<8x32xf32>
    %51 = vector.extract_strided_slice %3 {offsets = [0, 5], sizes = [8, 1], strides = [1, 1]} : vector<8x8xi32> to vector<8x1xi32>
    %52 = vector.broadcast %51 : vector<8x1xi32> to vector<8x50xi32>
    %53 = arith.cmpi eq, %52, %4 : vector<8x50xi32>
    %54 = arith.extui %53 : vector<8x50xi1> to vector<8x50xi32>
    %55 = arith.sitofp %54 : vector<8x50xi32> to vector<8x50xf32>
    %c5 = arith.constant 5 : index
    %c0_16 = arith.constant 0 : index
    %c0_17 = arith.constant 0 : index
    %56 = vector.load %arg2[%c5, %c0_16, %c0_17] : memref<8x50x32xf32, #tpu.memory_space<vmem>>, vector<1x50x32xf32>
    %57 = vector.shape_cast %56 : vector<1x50x32xf32> to vector<50x32xf32>
    %cst_18 = arith.constant dense<0.000000e+00> : vector<8x32xf32>
    %58 = tpu.matmul %55, %57, %cst_18 {dimension_numbers = #tpu.dot_dimension_numbers<[1], [0], [0], [1], [0, 0, 1, 1], [], []>, precision = #tpu.contract_precision<fp32>} : vector<8x50xf32>, vector<50x32xf32>, vector<8x32xf32> -> vector<8x32xf32>
    %59 = arith.addf %50, %58 : vector<8x32xf32>
    %60 = vector.extract_strided_slice %3 {offsets = [0, 6], sizes = [8, 1], strides = [1, 1]} : vector<8x8xi32> to vector<8x1xi32>
    %61 = vector.broadcast %60 : vector<8x1xi32> to vector<8x50xi32>
    %62 = arith.cmpi eq, %61, %4 : vector<8x50xi32>
    %63 = arith.extui %62 : vector<8x50xi1> to vector<8x50xi32>
    %64 = arith.sitofp %63 : vector<8x50xi32> to vector<8x50xf32>
    %c6 = arith.constant 6 : index
    %c0_19 = arith.constant 0 : index
    %c0_20 = arith.constant 0 : index
    %65 = vector.load %arg2[%c6, %c0_19, %c0_20] : memref<8x50x32xf32, #tpu.memory_space<vmem>>, vector<1x50x32xf32>
    %66 = vector.shape_cast %65 : vector<1x50x32xf32> to vector<50x32xf32>
    %cst_21 = arith.constant dense<0.000000e+00> : vector<8x32xf32>
    %67 = tpu.matmul %64, %66, %cst_21 {dimension_numbers = #tpu.dot_dimension_numbers<[1], [0], [0], [1], [0, 0, 1, 1], [], []>, precision = #tpu.contract_precision<fp32>} : vector<8x50xf32>, vector<50x32xf32>, vector<8x32xf32> -> vector<8x32xf32>
    %68 = arith.addf %59, %67 : vector<8x32xf32>
    %69 = vector.extract_strided_slice %3 {offsets = [0, 7], sizes = [8, 1], strides = [1, 1]} : vector<8x8xi32> to vector<8x1xi32>
    %70 = vector.broadcast %69 : vector<8x1xi32> to vector<8x50xi32>
    %71 = arith.cmpi eq, %70, %4 : vector<8x50xi32>
    %72 = arith.extui %71 : vector<8x50xi1> to vector<8x50xi32>
    %73 = arith.sitofp %72 : vector<8x50xi32> to vector<8x50xf32>
    %c7 = arith.constant 7 : index
    %c0_22 = arith.constant 0 : index
    %c0_23 = arith.constant 0 : index
    %74 = vector.load %arg2[%c7, %c0_22, %c0_23] : memref<8x50x32xf32, #tpu.memory_space<vmem>>, vector<1x50x32xf32>
    %75 = vector.shape_cast %74 : vector<1x50x32xf32> to vector<50x32xf32>
    %cst_24 = arith.constant dense<0.000000e+00> : vector<8x32xf32>
    %76 = tpu.matmul %73, %75, %cst_24 {dimension_numbers = #tpu.dot_dimension_numbers<[1], [0], [0], [1], [0, 0, 1, 1], [], []>, precision = #tpu.contract_precision<fp32>} : vector<8x50xf32>, vector<50x32xf32>, vector<8x32xf32> -> vector<8x32xf32>
    %77 = arith.addf %68, %76 : vector<8x32xf32>
    %78 = arith.index_cast %1 : i32 to index
    %c0_25 = arith.constant 0 : index
    %79 = vector.load %arg3[%78, %c0_25] : memref<8x32xf32, #tpu.memory_space<vmem>>, vector<8x32xf32>
    tpu.vector_store %arg3[%78, %c0_25], %77 {strides = array<i32>} : memref<8x32xf32, #tpu.memory_space<vmem>>, vector<8x32xf32>,
    %c1_i32 = arith.constant 1 : i32
    return
  }
  func.func @transform_0(%arg0: i32) -> (i32, i32) {
    %c0_i32 = arith.constant 0 : i32
    %c0_i32_0 = arith.constant 0 : i32
    return %arg0, %c0_i32 : i32, i32
  }
  func.func @transform_1(%arg0: i32) -> (i32, i32, i32) {
    %c0_i32 = arith.constant 0 : i32
    %c0_i32_0 = arith.constant 0 : i32
    %c0_i32_1 = arith.constant 0 : i32
    %c0_i32_2 = arith.constant 0 : i32
    return %c0_i32, %c0_i32_0, %c0_i32_1 : i32, i32, i32
  }
  func.func @transform_2(%arg0: i32) -> (i32, i32) {
    %c0_i32 = arith.constant 0 : i32
    %c0_i32_0 = arith.constant 0 : i32
    return %arg0, %c0_i32 : i32, i32
  }
}

</mosaic_0001>

<bundles_post_ra>
// kernel: tpu_custom_call.1
= control target key start
LH: loop header
LB: loop body
LE: loop exit
PB: predicated region body
PF: predicated region fallthrough
CT: control target
= control target key end

     0   :  { %v6241_v2 = vmov 1   ;;  %v6242_v3 = vmov 0   ;;  %v6243_v12 = vmov 0.0|0.0   ;;  %s7630_s0 = inlined_call_operand.vmem [shape: s32[8,8], index: 0, kind: input, shape index: {}]   ;;  %s7631_s1 = inlined_call_operand.vmem [shape: f32[8,50,32], index: 1, kind: input, shape index: {}]   ;;  %s7632_s2 = inlined_call_operand.hbm [shape: f32[8,32], index: 2, kind: output, shape index: {}]  }
   0x1   :  { %v6271_v0 = vld [vmem:[%s7630_s0] sm:$0xff]  ;;  %v4392_v1 = vld [vmem:[%s7631_s1 + $0x38] sm:$0xff]  ;;  %6208 = vset.pattern.permute.xlu0 %v6241_v2  ;;  %6210 = vset.pattern.permute.xlu1 %v6242_v3  ;;  %v4394_v6 = vld [vmem:[%s7631_s1 + $0x48] sm:$0xff] }
   0x2   :  { %v4393_v4 = vld [vmem:[%s7631_s1 + $0x40] sm:$0xff]  ;;  %v51_v5 = vand.u32 4294901760, %v4392_v1  ;;  %v4395_v7 = vld [vmem:[%s7631_s1 + $0x50] sm:$0xff]  ;;  %29 = vperm.xlu0 %6208, %v6271_v0   ;;  %16 = vperm.xlu1 %6210, %v6271_v0   ;;  %v57_v9 = vand.u32 4294901760, %v4394_v6  ;;  %v4429_v11 = vld [vmem:[%s7631_s1 + $0xe8] sm:$0xff] }
   0x3   :  { %v54_v8 = vand.u32 4294901760, %v4393_v4  ;;  %v4428_v10 = vld [vmem:[%s7631_s1 + $0xe0] sm:$0xff]  ;;  %5671 = vmatprep.subr.bf16.mxu1 %v6243_v12  ;;  %v60_v14 = vand.u32 4294901760, %v4395_v7  ;;  %5887 = vmatprep.subr.bf16.mxu0 %v6243_v12  ;;  %v2218_v16 = vand.u32 4294901760, %v4429_v11  ;;  %v4396_v17 = vld [vmem:[%s7631_s1 + $0x58] sm:$0xff]  ;;  %v4430_v19 = vld [vmem:[%s7631_s1 + $0xf0] sm:$0xff] }
   0x4   :  { %v6294_v13 = vsub.f32 %v4392_v1, %v51_v5  ;;  %v2215_v15 = vand.u32 4294901760, %v4428_v10  ;;  %v4397_v18 = vld [vmem:[%s7631_s1 + $0x60] sm:$0xff]  ;;  %v63_v22 = vand.u32 4294901760, %v4396_v17  ;;  %v4431_v23 = vld [vmem:[%s7631_s1 + $0xf8] sm:$0xff] }
   0x5   :  { %v6306_v20 = vpack.c.bf16 %v54_v8, %v51_v5  ;;  %v6308_v21 = vsub.f32 %v4393_v4, %v54_v8 }
   0x6   :  { %7 = vsyncpa [#allocation3], 0  ;;  %v6313_v24 = vsub.f32 %v4394_v6, %v57_v9  ;;  %v6315_v25 = vsub.f32 %v4395_v7, %v60_v14  ;;  %v6317_v26 = vpack.c.bf16 %v2218_v16, %v2215_v15  ;;  %v6319_v27 = vsub.f32 %v4428_v10, %v2215_v15  ;;  %v4398_v34 = vld [vmem:[%s7631_s1 + $0x68] sm:$0x3]  ;;  %v4432_v35 = vld [vmem:[%s7631_s1 + $0x100] sm:$0xff] }
   0x7   :  { %v6244_v28 = vmov 4   ;;  %v6245_v29 = vmov 5   ;;  %v6321_v30 = vsub.f32 %v4429_v11, %v2218_v16  ;;  %v66_v31 = vand.u32 4294901760, %v4397_v18  ;;  %v4433_v36 = vld [vmem:[%s7631_s1 + $0x108] sm:$0xff]  ;;  %5673 = vmatpush3.bf16.msra.mxu1 %v6306_v20  ;;  %v4434_v57 = vld [vmem:[%s7631_s1 + $0x110] sm:$0x3] }
   0x8   :  { %6209 = vset.pattern.permute.xlu0 %v6244_v28  ;;  %6211 = vset.pattern.permute.xlu1 %v6245_v29  ;;  %v2221_v32 = vand.u32 4294901760, %v4430_v19  ;;  %v2224_v33 = vand.u32 4294901760, %v4431_v23  ;;  %vm46_vm0 = vcmask 1041408   ;;  %v135_v37 = vand.u32 4294901760, %v6294_v13 }
   0x9   :  { %2195 = vperm.xlu0 %6209, %v6271_v0   ;;  %2740 = vperm.xlu1 %6211, %v6271_v0   ;;  %v6336_v38 = vpack.c.bf16 %v60_v14, %v57_v9  ;;  %v2227_v40 = vand.u32 4294901760, %v4432_v35  ;;  %v6344_v41 = vsel %vm46_vm0, %v4398_v34, 0  ;;  %v2230_v42 = vand.u32 4294901760, %v4433_v36 }
   0xa   :  { %5889 = vmatpush3.bf16.msra.mxu0 %v6317_v26  ;;  %v6339_v39 = vpack.c.bf16 %v2224_v33, %v2221_v32  ;;  %5674 = vmatprep.subr.bf16.mxu1 %v6243_v12  ;;  %v136_v43 = vsub.f32 %v6294_v13, %v135_v37  ;;  %v142_v44 = vand.u32 4294901760, %v6308_v21  ;;  %v6350_v45 = vsub.f32 %v4396_v17, %v63_v22 }
   0xb   :  { %5890 = vmatprep.subr.bf16.mxu0 %v6243_v12  ;;  %v6352_v46 = vsub.f32 %v4397_v18, %v66_v31  ;;  %v6354_v47 = vsub.f32 %v4430_v19, %v2221_v32  ;;  %v6356_v48 = vsub.f32 %v4431_v23, %v2224_v33  ;;  %v6358_v49 = vpack.c.bf16 %v66_v31, %v63_v22 }
   0xc   :  { %v6360_v50 = vpack.c.bf16 %v2230_v42, %v2227_v40  ;;  %v6362_v51 = vsub.f32 %v4432_v35, %v2227_v40  ;;  %5676 = vmatpush3.bf16.msra.mxu1 %v6336_v38  ;;  %v6366_v52 = vsub.f32 %v4433_v36, %v2230_v42  ;;  %v137_v53 = vand.u32 4294901760, %v136_v43 }
   0xd   :  { %v143_v54 = vsub.f32 %v6308_v21, %v142_v44  ;;  %v149_v55 = vand.u32 4294901760, %v6313_v24  ;;  %5677 = vmatprep.subr.bf16.mxu1 %v6243_v12  ;;  %v6374_v56 = vand.u32 4294901760, %v6344_v41  ;;  %v156_v58 = vand.u32 4294901760, %v6315_v25 }
   0xe   :  { %5892 = vmatpush3.bf16.msra.mxu0 %v6339_v39  ;;  %v2299_v59 = vand.u32 4294901760, %v6319_v27  ;;  %v2306_v60 = vand.u32 4294901760, %v6321_v30  ;;  %vm6246_vm1 = vmmov 0   ;;  %v6247_v61 = vmov 0.0  }
   0xf   :  { %5893 = vmatprep.subr.bf16.mxu0 %v6243_v12  ;;  %4869 = vmatprep.mubr.msk.f32.mxu1 %vm6246_vm1, %v6247_v61  ;;  %v144_v62 = vand.u32 4294901760, %v143_v54  ;;  %v6386_v63 = vsel %vm46_vm0, %v4434_v57, 0  ;;  %v150_v1 = vsub.f32 %v6313_v24, %v149_v55  ;;  %v163_v2 = vand.u32 4294901760, %v6350_v45 }
  0x10   :  { %5277 = vmatprep.mubr.msk.f32.mxu0 %vm6246_vm1, %v6247_v61  ;;  %v6395_v3 = vand.u32 4294901760, %v6386_v63  ;;  %v157_v4 = vsub.f32 %v6315_v25, %v156_v58  ;;  %v2300_v5 = vsub.f32 %v6319_v27, %v2299_v59  ;;  %v2307_v6 = vsub.f32 %v6321_v30, %v2306_v60  ;;  %5679 = vmatpush3.bf16.msra.mxu1 %v6358_v49 }
  0x11   :  { %v6406_v7 = vpack.c.bf16 %v144_v62, %v137_v53  ;;  %v151_v8 = vand.u32 4294901760, %v150_v1  ;;  %v164_v9 = vsub.f32 %v6350_v45, %v163_v2  ;;  %v170_v10 = vand.u32 4294901760, %v6352_v46  ;;  %4867 = vmatprep.subr.mxu1 %v6247_v61 }
  0x12   :  { %5895 = vmatpush3.bf16.msra.mxu0 %v6360_v50  ;;  %v158_v11 = vand.u32 4294901760, %v157_v4  ;;  %v2301_v14 = vand.u32 4294901760, %v2300_v5  ;;  %v2308_v15 = vand.u32 4294901760, %v2307_v6  ;;  %v2313_v18 = vand.u32 4294901760, %v6354_v47 }
  0x13   :  { %5275 = vmatprep.subr.mxu0 %v6247_v61  ;;  %v165_v16 = vand.u32 4294901760, %v164_v9  ;;  %v171_v17 = vsub.f32 %v6352_v46, %v170_v10  ;;  %v2320_v19 = vand.u32 4294901760, %v6356_v48  ;;  %v2327_v28 = vand.u32 4294901760, %v6362_v51 }
  0x14   :  { %v6415_v22 = vpack.c.bf16 %v158_v11, %v151_v8  ;;  %v6417_v23 = vpack.c.bf16 %v2308_v15, %v2301_v14  ;;  %v2334_v29 = vand.u32 4294901760, %v6366_v52  ;;  %4868 = vmatpush3.msra.mxu1 %v6374_v56  ;;  %v2314_v32 = vsub.f32 %v6354_v47, %v2313_v18 }
  0x15   :  { %v172_v31 = vand.u32 4294901760, %v171_v17  ;;  %v2321_v33 = vsub.f32 %v6356_v48, %v2320_v19  ;;  %5680 = vmatprep.subr.bf16.mxu1 %v6243_v12  ;;  %v2328_v34 = vsub.f32 %v6362_v51, %v2327_v28  ;;  %v5690_v62 = vpack.c.bf16 %v6308_v21, %v6294_v13  ;;  %v21_v21 = vld [vmem:[%s7631_s1] sm:$0xff] }
  0x16   :  { %5276 = vmatpush3.msra.mxu0 %v6395_v3  ;;  %v2335_v35 = vsub.f32 %v6366_v52, %v2334_v29  ;;  %v2315_v40 = vand.u32 4294901760, %v2314_v32  ;;  %v5693_v1 = vpack.c.bf16 %v6315_v25, %v6313_v24  ;;  %v5906_v4 = vpack.c.bf16 %v6321_v30, %v6319_v27  ;;  %v22_v24 = vld [vmem:[%s7631_s1 + $0x8] sm:$0xff] }
  0x17   :  { %5896 = vmatprep.subr.bf16.mxu0 %v6243_v12  ;;  %v6429_v36 = vpack.c.bf16 %v172_v31, %v165_v16  ;;  %v2322_v42 = vand.u32 4294901760, %v2321_v33  ;;  %v2329_v43 = vand.u32 4294901760, %v2328_v34  ;;  %v5696_v5 = vpack.c.bf16 %v6352_v46, %v6350_v45  ;;  %v23_v45 = vld [vmem:[%s7631_s1 + $0x10] sm:$0xff]  ;;  %v4439_v46 = vld [vmem:[%s7631_s1 + $0x118] sm:$0xff] }
  0x18   :  { %v2336_v53 = vand.u32 4294901760, %v2335_v35  ;;  %v5909_v6 = vpack.c.bf16 %v6356_v48, %v6354_v47  ;;  %v5912_v8 = vpack.c.bf16 %v6366_v52, %v6362_v51  ;;  %v6248_v9 = vmov 2   ;;  %v25_v51 = vld [vmem:[%s7631_s1 + $0x20] sm:$0xff]  ;;  %v26_v52 = vld [vmem:[%s7631_s1 + $0x28] sm:$0xff] }
  0x19   :  { %v5900_v54 = vpack.c.bf16 %v2322_v42, %v2315_v40  ;;  %6212 = vset.pattern.permute.xlu1 %v6248_v9  ;;  %v6249_v11 = vmov 6   ;;  %v6451_v14 = vpack.c.bf16 %v142_v44, %v135_v37  ;;  %v6457_v15 = vpack.c.bf16 %v156_v58, %v149_v55 }
  0x1a   :  { %v6431_v57 = vpack.c.bf16 %v2336_v53, %v2329_v43  ;;  %1105 = vperm.xlu1 %6212, %v6271_v0   ;;  %6213 = vset.pattern.permute.xlu0 %v6249_v11  ;;  %v6461_v16 = vpack.c.bf16 %v2306_v60, %v2299_v59  ;;  %v6463_v17 = vpack.c.bf16 %v170_v10, %v163_v2  ;;  %v13_v33 = vlaneseq }
  0x1b   :  { %3285 = vperm.xlu0 %6213, %v6271_v0   ;;  %v6465_v31 = vpack.c.bf16 %v2320_v19, %v2313_v18  ;;  %v6467_v32 = vpack.c.bf16 %v2334_v29, %v2327_v28  ;;  %v6250_v34 = vmov 3   ;;  %v6251_v44 = vmov 7  }
  0x1c   :  { %v6470_v37 = vand.u32 127, %v13_v33  ;;  %vm42_vm2 = vcmask 408576   ;;  %v6495_v29 = vsub.f32 %v6344_v41, %v6374_v56  ;;  %v6508_v41 = vsub.f32 %v6386_v63, %v6395_v3 }
  0x1d   :  { %v581_v25 = vand.u32 4294901760, %v21_v21  ;;  %v584_v27 = vand.u32 4294901760, %v22_v24  ;;  %vm4374_vm11 = vcmask 261120  }
  0x1e   :  { %6214 = vset.pattern.permute.xlu1 %v6250_v34  ;;  %v177_v43 = vand.u32 4294901760, %v6495_v29  ;;  %v2341_v9 = vand.u32 4294901760, %v6508_v41 }
  0x1f   :  { %1650 = vperm.xlu1 %6214, %v6271_v0   ;;  %6216 = vset.pattern.permute.xlu0 %v6251_v44  ;;  %v6645_v47 = vsub.f32 %v21_v21, %v581_v25  ;;  %v6647_v48 = vsub.f32 %v22_v24, %v584_v27  ;;  %v4445_v24 = vld [vmem:[%s7631_s1 + $0x148] sm:$0x3] }
  0x23   :  { %6215 = vset.pattern.permute.xlu1 %v6251_v44 }
  0x24   :  { %3830 = vperm.xlu1 %6215, %v6271_v0  }
  0x81   :  { %v30_v55 = vpop.permute.xlu0 %29  ;;  %v17_v13 = vpop.permute.xlu1 %16 }
  0x82   :  { %vm31_vm3 = vcmp.eq.s32.totalorder %v30_v55, %v6470_v37  ;;  %vm18_vm5 = vcmp.eq.s32.totalorder %v17_v13, %v6470_v37 }
  0x83   :  { %v6475_v58 = vsel %vm31_vm3, 1.0, %v6247_v61 }
  0x84   :  { %v44_v59 = vsel %vm42_vm2, %v6475_v58, 0 }
  0x85   :  { %v6479_v60 = vsub.f32 %v44_v59, %v44_v59 }
  0x87   :  { %v124_v10 = vand.u32 4294901760, %v6479_v60 }
  0x88   :  { %v2196_v2 = vpop.permute.xlu0 %2195  ;;  %v2741_v30 = vpop.permute.xlu1 %2740 }
  0x89   :  { %vm2197_vm4 = vcmp.eq.s32.totalorder %v2196_v2, %v6470_v37  ;;  %v125_v19 = vsub.f32 %v6479_v60, %v124_v10  ;;  %vm2742_vm6 = vcmp.eq.s32.totalorder %v2741_v30, %v6470_v37 }
  0x8a   :  { %v6484_v18 = vsel %vm2197_vm4, 1.0, %v6247_v61 }
  0x8b   :  { %v2209_v0 = vsel %vm42_vm2, %v6484_v18, 0  ;;  %v126_v35 = vand.u32 4294901760, %v125_v19 }
  0x8c   :  { %v6491_v28 = vsub.f32 %v2209_v0, %v2209_v0 }
  0x8d   :  { %4870 = vmatmul.mubr.f32.vlgmr.msra.gmra.mrb[0].mxu1 %v126_v35 }
  0x8e   :  { %v2288_v40 = vand.u32 4294901760, %v6491_v28  ;;  %5682 = vmatpush3.bf16.msra.mxu1 %v6406_v7  ;;  %4886 = vmatprep.mubr.msk.f32.mxu1 %vm6246_vm1, %v6247_v61  ;;  %v178_v7 = vsub.f32 %v6495_v29, %v177_v43 }
  0x8f   :  { %5683 = vmatprep.subr.bf16.mxu1 %v6243_v12 }
  0x90   :  { %v2289_v42 = vsub.f32 %v6491_v28, %v2288_v40  ;;  %v179_v63 = vand.u32 4294901760, %v178_v7 }
  0x92   :  { %v2290_v53 = vand.u32 4294901760, %v2289_v42  ;;  %5685 = vmatpush3.bf16.msra.mxu1 %v6415_v22  ;;  %v2342_v22 = vsub.f32 %v6508_v41, %v2341_v9 }
  0x93   :  { %5686 = vmatprep.subr.bf16.mxu1 %v6243_v12 }
  0x94   :  { %5278 = vmatmul.mubr.f32.vlgmr.msra.gmra.mrb[0].mxu0 %v2290_v53 }
  0x95   :  { %5898 = vmatpush3.bf16.msra.mxu0 %v6417_v23  ;;  %5294 = vmatprep.mubr.msk.f32.mxu0 %vm6246_vm1, %v6247_v61  ;;  %v2343_v23 = vand.u32 4294901760, %v2342_v22 }
  0x96   :  { %5899 = vmatprep.subr.bf16.mxu0 %v6243_v12  ;;  %5688 = vmatpush3.bf16.msra.mxu1 %v6429_v36 }
  0x97   :  { %4884 = vmatprep.subr.mxu1 %v6247_v61 }
  0x99   :  { %5901 = vmatpush3.bf16.msra.mxu0 %v5900_v54  ;;  %v6665_v54 = vpack.c.bf16 %v584_v27, %v581_v25 }
  0x9a   :  { %5902 = vmatprep.subr.bf16.mxu0 %v6243_v12  ;;  %4885 = vmatpush3.msra.mxu1 %v179_v63 }
  0x9b   :  { %4887 = vmatmul.mubr.msk.f32.vlgmr.msra.gmra.mrb[0].mxu1 %vm42_vm2, %v6475_v58  ;;  %5689 = vmatprep.subr.bf16.mxu1 %v6243_v12 }
  0x9c   :  { %5691 = vmatpush3.bf16.msra.mxu1 %v5690_v62  ;;  %4903 = vmatprep.mubr.msk.f32.mxu1 %vm6246_vm1, %v6247_v61 }
  0x9d   :  { %5904 = vmatpush3.bf16.msra.mxu0 %v6431_v57  ;;  %5692 = vmatprep.subr.bf16.mxu1 %v6243_v12  ;;  %v587_v57 = vand.u32 4294901760, %v23_v45 }
  0x9e   :  { %5292 = vmatprep.subr.mxu0 %v6247_v61 }
  0xa0   :  { %5694 = vmatpush3.bf16.msra.mxu1 %v5693_v1  ;;  %v2760_v1 = vand.u32 4294901760, %v4439_v46 }
  0xa1   :  { %5293 = vmatpush3.msra.mxu0 %v2343_v23  ;;  %5695 = vmatprep.subr.bf16.mxu1 %v6243_v12 }
  0xa2   :  { %5295 = vmatmul.mubr.msk.f32.vlgmr.msra.gmra.mrb[0].mxu0 %vm42_vm2, %v6484_v18  ;;  %5905 = vmatprep.subr.bf16.mxu0 %v6243_v12 }
  0xa3   :  { %5907 = vmatpush3.bf16.msra.mxu0 %v5906_v4  ;;  %5311 = vmatprep.mubr.msk.f32.mxu0 %vm6246_vm1, %v6247_v61 }
  0xa4   :  { %5908 = vmatprep.subr.bf16.mxu0 %v6243_v12  ;;  %5697 = vmatpush3.bf16.msra.mxu1 %v5696_v5  ;;  %v593_v5 = vand.u32 4294901760, %v25_v51 }
  0xa5   :  { %4901 = vmatprep.subr.mxu1 %v6247_v61 }
  0xa6   :  { %v6720_v19 = vsub.f32 %v25_v51, %v593_v5 }
  0xa7   :  { %5910 = vmatpush3.bf16.msra.mxu0 %v5909_v6  ;;  %v596_v6 = vand.u32 4294901760, %v26_v52 }
  0xa8   :  { %5911 = vmatprep.subr.bf16.mxu0 %v6243_v12  ;;  %4902 = vmatpush3.msra.mxu1 %v6495_v29  ;;  %v4444_v29 = vld [vmem:[%s7631_s1 + $0x140] sm:$0xff]  ;;  %v693_v27 = vand.u32 4294901760, %v6720_v19 }
  0xa9   :  { %4904 = vmatmul.mubr.f32.vlgmr.msra.gmra.mrb[0].mxu1 %v6479_v60  ;;  %5698 = vmatprep.subr.bf16.mxu1 %v6243_v12  ;;  %v2775_v13 = vand.u32 4294901760, %v4444_v29 }
  0xaa   :  { %5700 = vmatpush3.bf16.msra.mxu1 %v6306_v20  ;;  %4920 = vmatprep.mubr.msk.f32.mxu1 %vm6246_vm1, %v6247_v61 }
  0xab   :  { %5913 = vmatpush3.bf16.msra.mxu0 %v5912_v8  ;;  %5701 = vmatprep.subr.bf16.mxu1 %v6243_v12  ;;  %v4442_v8 = vld [vmem:[%s7631_s1 + $0x130] sm:$0xff] }
  0xac   :  { %5309 = vmatprep.subr.mxu0 %v6247_v61  ;;  %v2769_v44 = vand.u32 4294901760, %v4442_v8 }
  0xae   :  { %5703 = vmatpush3.bf16.msra.mxu1 %v6336_v38 }
  0xaf   :  { %5310 = vmatpush3.msra.mxu0 %v6508_v41  ;;  %5704 = vmatprep.subr.bf16.mxu1 %v6243_v12 }
  0xb0   :  { %5312 = vmatmul.mubr.f32.vlgmr.msra.gmra.mrb[0].mxu0 %v6491_v28  ;;  %5914 = vmatprep.subr.bf16.mxu0 %v6243_v12  ;;  %v6722_v28 = vsub.f32 %v26_v52, %v596_v6  ;;  %v6780_v52 = vsub.f32 %v4444_v29, %v2775_v13 }
  0xb1   :  { %5916 = vmatpush3.bf16.msra.mxu0 %v6317_v26  ;;  %5328 = vmatprep.mubr.msk.f32.mxu0 %vm6246_vm1, %v6247_v61 }
  0xb2   :  { %5917 = vmatprep.subr.bf16.mxu0 %v6243_v12  ;;  %5706 = vmatpush3.bf16.msra.mxu1 %v6358_v49  ;;  %v700_v30 = vand.u32 4294901760, %v6722_v28 }
  0xb3   :  { %4918 = vmatprep.subr.mxu1 %v6247_v61 }
  0xb5   :  { %5919 = vmatpush3.bf16.msra.mxu0 %v6339_v39 }
  0xb6   :  { %5920 = vmatprep.subr.bf16.mxu0 %v6243_v12  ;;  %4919 = vmatpush3.msra.mxu1 %v6374_v56 }
  0xb7   :  { %4921 = vmatmul.mubr.f32.vlgmr.msra.gmra.mrb[0].mxu1 %v124_v10  ;;  %5707 = vmatprep.subr.bf16.mxu1 %v6243_v12 }
  0xb8   :  { %5709 = vmatpush3.bf16.msra.mxu1 %v6451_v14  ;;  %4937 = vmatprep.mubr.msk.f32.mxu1 %vm6246_vm1, %v6247_v61  ;;  %v6678_v14 = vsel %vm2742_vm6, 1.0, %v6247_v61 }
  0xb9   :  { %5922 = vmatpush3.bf16.msra.mxu0 %v6360_v50  ;;  %5710 = vmatprep.subr.bf16.mxu1 %v6243_v12  ;;  %v2754_v55 = vsel %vm42_vm2, %v6678_v14, 0 }
  0xba   :  { %5326 = vmatprep.subr.mxu0 %v6247_v61  ;;  %v6731_v42 = vsub.f32 %v2754_v55, %v2754_v55 }
  0xbc   :  { %5712 = vmatpush3.bf16.msra.mxu1 %v6457_v15  ;;  %v672_v15 = vand.u32 4294901760, %v6647_v48 }
  0xbd   :  { %5327 = vmatpush3.msra.mxu0 %v6395_v3  ;;  %5713 = vmatprep.subr.bf16.mxu1 %v6243_v12 }
  0xbe   :  { %5329 = vmatmul.mubr.f32.vlgmr.msra.gmra.mrb[0].mxu0 %v2288_v40  ;;  %5923 = vmatprep.subr.bf16.mxu0 %v6243_v12  ;;  %v673_v0 = vsub.f32 %v6647_v48, %v672_v15 }
  0xbf   :  { %5925 = vmatpush3.bf16.msra.mxu0 %v6461_v16  ;;  %5345 = vmatprep.mubr.msk.f32.mxu0 %vm6246_vm1, %v6247_v61  ;;  %v6683_v16 = vsub.f32 %v23_v45, %v587_v57 }
  0xc0   :  { %5926 = vmatprep.subr.bf16.mxu0 %v6243_v12  ;;  %5715 = vmatpush3.bf16.msra.mxu1 %v6463_v17  ;;  %v674_v21 = vand.u32 4294901760, %v673_v0  ;;  %v2879_v0 = vand.u32 4294901760, %v6780_v52 }
  0xc1   :  { %4935 = vmatprep.subr.mxu1 %v6247_v61  ;;  %v679_v35 = vand.u32 4294901760, %v6683_v16 }
  0xc3   :  { %5928 = vmatpush3.bf16.msra.mxu0 %v6465_v31  ;;  %v27_v31 = vld [vmem:[%s7631_s1 + $0x30] sm:$0x3] }
  0xc4   :  { %5929 = vmatprep.subr.bf16.mxu0 %v6243_v12  ;;  %4936 = vmatpush3.msra.mxu1 %v177_v43  ;;  %v578_v60 = vsel %vm46_vm0, %v27_v31, 0  ;;  %v701_v31 = vsub.f32 %v6722_v28, %v700_v30 }
  0xc5   :  { %4938 = vmatmul.mubr.msk.f32.vlgmr.msra.gmra.mrb[0].mxu1 %vm42_vm2, %v6475_v58  ;;  %5716 = vmatprep.subr.bf16.mxu1 %v6243_v12  ;;  %v6743_v63 = vand.u32 4294901760, %v578_v60 }
  0xc6   :  { %5718 = vmatpush3.bf16.msra.mxu1 %v6306_v20  ;;  %4954 = vmatprep.mubr.msk.f32.mxu1 %vm6246_vm1, %v6247_v61  ;;  %v6631_v20 = vsel %vm18_vm5, 1.0, %v6247_v61 }
  0xc7   :  { %5931 = vmatpush3.bf16.msra.mxu0 %v6467_v32  ;;  %5719 = vmatprep.subr.bf16.mxu1 %v6243_v12  ;;  %v575_v36 = vsel %vm42_vm2, %v6631_v20, 0  ;;  %v6693_v32 = vsub.f32 %v4439_v46, %v2760_v1  ;;  %v6766_v45 = vsub.f32 %v578_v60, %v6743_v63 }
  0xc8   :  { %5343 = vmatprep.subr.mxu0 %v6247_v61  ;;  %v6675_v11 = vsub.f32 %v575_v36, %v575_v36 }
  0xc9   :  { %v2844_v41 = vand.u32 4294901760, %v6693_v32 }
  0xca   :  { %5721 = vmatpush3.bf16.msra.mxu1 %v6336_v38  ;;  %v24_v38 = vld [vmem:[%s7631_s1 + $0x18] sm:$0xff]  ;;  %v654_v2 = vand.u32 4294901760, %v6675_v11 }
  0xcb   :  { %5344 = vmatpush3.msra.mxu0 %v2341_v9  ;;  %5722 = vmatprep.subr.bf16.mxu1 %v6243_v12  ;;  %v590_v62 = vand.u32 4294901760, %v24_v38  ;;  %v6741_v9 = vsub.f32 %v4442_v8, %v2769_v44  ;;  %v2845_v46 = vsub.f32 %v6693_v32, %v2844_v41  ;;  %v694_v8 = vsub.f32 %v6720_v19, %v693_v27 }
  0xcc   :  { %5346 = vmatmul.mubr.msk.f32.vlgmr.msra.gmra.mrb[0].mxu0 %vm42_vm2, %v6484_v18  ;;  %5932 = vmatprep.subr.bf16.mxu0 %v6243_v12  ;;  %v655_v23 = vsub.f32 %v6675_v11, %v654_v2 }
  0xcd   :  { %5934 = vmatpush3.bf16.msra.mxu0 %v6317_v26  ;;  %5362 = vmatprep.mubr.msk.f32.mxu0 %vm6246_vm1, %v6247_v61  ;;  %v4440_v26 = vld [vmem:[%s7631_s1 + $0x120] sm:$0xff]  ;;  %v6685_v17 = vsub.f32 %v24_v38, %v590_v62  ;;  %v2833_v38 = vand.u32 4294901760, %v6731_v42 }
  0xce   :  { %5935 = vmatprep.subr.bf16.mxu0 %v6243_v12  ;;  %5724 = vmatpush3.bf16.msra.mxu1 %v6358_v49  ;;  %v2763_v4 = vand.u32 4294901760, %v4440_v26  ;;  %v4441_v49 = vld [vmem:[%s7631_s1 + $0x128] sm:$0xff] }
  0xcf   :  { %4952 = vmatprep.subr.mxu1 %v6247_v61  ;;  %v2766_v34 = vand.u32 4294901760, %v4441_v49  ;;  %v686_v40 = vand.u32 4294901760, %v6685_v17 }
  0xd0   :  { %v6695_v33 = vsub.f32 %v4440_v26, %v2763_v4  ;;  %v6703_v59 = vpack.c.bf16 %v2763_v4, %v2760_v1 }
  0xd1   :  { %5937 = vmatpush3.bf16.msra.mxu0 %v6339_v39  ;;  %v665_v39 = vand.u32 4294901760, %v6645_v47  ;;  %v6733_v43 = vpack.c.bf16 %v2769_v44, %v2766_v34  ;;  %v6739_v7 = vsub.f32 %v4441_v49, %v2766_v34  ;;  %v687_v25 = vsub.f32 %v6685_v17, %v686_v40 }
  0xd2   :  { %5938 = vmatprep.subr.bf16.mxu0 %v6243_v12  ;;  %4953 = vmatpush3.msra.mxu1 %v6374_v56  ;;  %v6699_v56 = vpack.c.bf16 %v590_v62, %v587_v57  ;;  %v2851_v53 = vand.u32 4294901760, %v6695_v33  ;;  %v2865_v57 = vand.u32 4294901760, %v6741_v9  ;;  %v656_v62 = vand.u32 4294901760, %v655_v23 }
  0xd3   :  { %4955 = vmatmul.mubr.msk.f32.vlgmr.msra.gmra.mrb[0].mxu1 %vm42_vm2, %v6475_v58  ;;  %5725 = vmatprep.subr.bf16.mxu1 %v6243_v12  ;;  %v6705_v58 = vpack.c.bf16 %v596_v6, %v593_v5  ;;  %v666_v10 = vsub.f32 %v6645_v47, %v665_v39  ;;  %v2858_v36 = vand.u32 4294901760, %v6739_v7  ;;  %v2757_v5 = vsel %vm46_vm0, %v4445_v24, 0 }
  0xd4   :  { %5727 = vmatpush3.bf16.msra.mxu1 %v6665_v54  ;;  %4971 = vmatprep.mubr.msk.f32.mxu1 %vm6246_vm1, %v6247_v61  ;;  %v2852_v26 = vsub.f32 %v6695_v33, %v2851_v53  ;;  %v688_v49 = vand.u32 4294901760, %v687_v25  ;;  %v2834_v34 = vsub.f32 %v6731_v42, %v2833_v38  ;;  %v2846_v44 = vand.u32 4294901760, %v2845_v46 }
  0xd5   :  { %5940 = vmatpush3.bf16.msra.mxu0 %v6360_v50  ;;  %5728 = vmatprep.subr.bf16.mxu1 %v6243_v12  ;;  %v4443_v50 = vld [vmem:[%s7631_s1 + $0x138] sm:$0xff]  ;;  %v2859_v60 = vsub.f32 %v6739_v7, %v2858_v36  ;;  %v6809_v29 = vand.u32 4294901760, %v2757_v5  ;;  %v695_v23 = vand.u32 4294901760, %v694_v8 }
  0xd6   :  { %5360 = vmatprep.subr.mxu0 %v6247_v61  ;;  %v2772_v22 = vand.u32 4294901760, %v4443_v50  ;;  %v2853_v55 = vand.u32 4294901760, %v2852_v26  ;;  %v2835_v24 = vand.u32 4294901760, %v2834_v34 }
  0xd7   :  { %v2860_v25 = vand.u32 4294901760, %v2859_v60 }
  0xd8   :  { %5730 = vmatpush3.bf16.msra.mxu1 %v6699_v56  ;;  %v6778_v51 = vsub.f32 %v4443_v50, %v2772_v22  ;;  %v6785_v1 = vpack.c.bf16 %v2775_v13, %v2772_v22  ;;  %v2866_v50 = vsub.f32 %v6741_v9, %v2865_v57  ;;  %v702_v13 = vand.u32 4294901760, %v701_v31 }
  0xd9   :  { %5361 = vmatpush3.msra.mxu0 %v6395_v3  ;;  %v667_v3 = vand.u32 4294901760, %v666_v10  ;;  %5731 = vmatprep.subr.bf16.mxu1 %v6243_v12 }
  0xda   :  { %5363 = vmatmul.mubr.msk.f32.vlgmr.msra.gmra.mrb[0].mxu0 %vm42_vm2, %v6484_v18  ;;  %5941 = vmatprep.subr.bf16.mxu0 %v6243_v12  ;;  %v680_v18 = vsub.f32 %v6683_v16, %v679_v35  ;;  %v2872_v10 = vand.u32 4294901760, %v6778_v51  ;;  %v2867_v46 = vand.u32 4294901760, %v2866_v50 }
  0xdb   :  { %5943 = vmatpush3.bf16.msra.mxu0 %v6703_v59  ;;  %5379 = vmatprep.mubr.msk.f32.mxu0 %vm6246_vm1, %v6247_v61  ;;  %v5735_v4 = vpack.c.bf16 %v674_v21, %v667_v3  ;;  %v707_v3 = vand.u32 4294901760, %v6766_v45  ;;  %v6816_v21 = vsub.f32 %v2757_v5, %v6809_v29 }
  0xdc   :  { %5944 = vmatprep.subr.bf16.mxu0 %v6243_v12  ;;  %5733 = vmatpush3.bf16.msra.mxu1 %v6705_v58  ;;  %v681_v6 = vand.u32 4294901760, %v680_v18  ;;  %v5951_v18 = vpack.c.bf16 %v2853_v55, %v2846_v44  ;;  %v2873_v26 = vsub.f32 %v6778_v51, %v2872_v10  ;;  %v5744_v55 = vpack.c.bf16 %v6647_v48, %v6645_v47 }
  0xdd   :  { %4969 = vmatprep.subr.mxu1 %v6247_v61  ;;  %v708_v5 = vsub.f32 %v6766_v45, %v707_v3  ;;  %v2886_v31 = vand.u32 4294901760, %v6816_v21  ;;  %v5765_v47 = vpack.c.bf16 %v686_v40, %v679_v35  ;;  %v5978_v48 = vpack.c.bf16 %v2851_v53, %v2844_v41  ;;  %v4450_v35 = vld [vmem:[%s7631_s1 + $0x150] sm:$0xff]  ;;  %v4411_v41 = vld [vmem:[%s7631_s1 + $0x98] sm:$0xff] }
  0xde   :  { %v5738_v22 = vpack.c.bf16 %v688_v49, %v681_v6  ;;  %v5954_v6 = vpack.c.bf16 %v2867_v46, %v2860_v25  ;;  %v2874_v49 = vand.u32 4294901760, %v2873_v26  ;;  %v5762_v25 = vpack.c.bf16 %v672_v15, %v665_v39 }
  0xdf   :  { %5946 = vmatpush3.bf16.msra.mxu0 %v6733_v43  ;;  %v709_v34 = vand.u32 4294901760, %v708_v5  ;;  %v2887_v60 = vsub.f32 %v6816_v21, %v2886_v31  ;;  %v5981_v39 = vpack.c.bf16 %v2865_v57, %v2858_v36  ;;  %v5984_v15 = vpack.c.bf16 %v2879_v0, %v2872_v10  ;;  %v4453_v36 = vld [vmem:[%s7631_s1 + $0x168] sm:$0xff] }
  0xe0   :  { %5947 = vmatprep.subr.bf16.mxu0 %v6243_v12  ;;  %4970 = vmatpush3.msra.mxu1 %v6743_v63  ;;  %v3314_v5 = vand.u32 4294901760, %v4453_v36 }
  0xe1   :  { %4972 = vmatmul.mubr.f32.vlgmr.msra.gmra.mrb[0].mxu1 %v656_v62  ;;  %5734 = vmatprep.subr.bf16.mxu1 %v6243_v12  ;;  %v2880_v62 = vsub.f32 %v6780_v52, %v2879_v0  ;;  %v2888_v50 = vand.u32 4294901760, %v2887_v60 }
  0xe2   :  { %5736 = vmatpush3.bf16.msra.mxu1 %v5735_v4  ;;  %4988 = vmatprep.mubr.msk.f32.mxu1 %vm6246_vm1, %v6247_v61  ;;  %v5741_v4 = vpack.c.bf16 %v702_v13, %v695_v23  ;;  %v5960_v23 = vpack.c.bf16 %v6695_v33, %v6693_v32  ;;  %v5750_v13 = vpack.c.bf16 %v6722_v28, %v6720_v19  ;;  %v4407_v32 = vld [vmem:[%s7631_s1 + $0x78] sm:$0xff]  ;;  %v3286_v19 = vpop.permute.xlu0 %3285  ;;  %v4408_v28 = vld [vmem:[%s7631_s1 + $0x80] sm:$0xff] }
  0xe3   :  { %5949 = vmatpush3.bf16.msra.mxu0 %v6785_v1  ;;  %5737 = vmatprep.subr.bf16.mxu1 %v6243_v12  ;;  %v2881_v8 = vand.u32 4294901760, %v2880_v62  ;;  %v1128_v33 = vand.u32 4294901760, %v4407_v32  ;;  %vm3287_vm8 = vcmp.eq.s32.totalorder %v3286_v19, %v6470_v37 }
  0xe4   :  { %5377 = vmatprep.subr.mxu0 %v6247_v61 }
  0xe5   :  { %v5957_v44 = vpack.c.bf16 %v2881_v8, %v2874_v49  ;;  %v6985_v53 = vsub.f32 %v4407_v32, %v1128_v33 }
  0xe6   :  { %5739 = vmatpush3.bf16.msra.mxu1 %v5738_v22  ;;  %v5747_v22 = vpack.c.bf16 %v6685_v17, %v6683_v16  ;;  %v1106_v16 = vpop.permute.xlu1 %1105  ;;  %v4406_v17 = vld [vmem:[%s7631_s1 + $0x70] sm:$0xff] }
  0xe7   :  { %5378 = vmatpush3.msra.mxu0 %v6809_v29  ;;  %5740 = vmatprep.subr.bf16.mxu1 %v6243_v12  ;;  %vm1107_vm7 = vcmp.eq.s32.totalorder %v1106_v16, %v6470_v37  ;;  %v1216_v46 = vand.u32 4294901760, %v6985_v53 }
  0xe8   :  { %5380 = vmatmul.mubr.f32.vlgmr.msra.gmra.mrb[0].mxu0 %v2835_v24  ;;  %5950 = vmatprep.subr.bf16.mxu0 %v6243_v12  ;;  %v5963_v24 = vpack.c.bf16 %v6741_v9, %v6739_v7 }
  0xe9   :  { %5952 = vmatpush3.bf16.msra.mxu0 %v5951_v18  ;;  %5396 = vmatprep.mubr.msk.f32.mxu0 %vm6246_vm1, %v6247_v61  ;;  %v5966_v18 = vpack.c.bf16 %v6780_v52, %v6778_v51  ;;  %v1140_v52 = vand.u32 4294901760, %v4411_v41 }
  0xea   :  { %5953 = vmatprep.subr.bf16.mxu0 %v6243_v12  ;;  %5742 = vmatpush3.bf16.msra.mxu1 %v5741_v4 }
  0xeb   :  { %4986 = vmatprep.subr.mxu1 %v6247_v61  ;;  %v7046_v60 = vsub.f32 %v4411_v41, %v1140_v52 }
  0xed   :  { %5955 = vmatpush3.bf16.msra.mxu0 %v5954_v6  ;;  %v1244_v19 = vand.u32 4294901760, %v7046_v60 }
  0xee   :  { %5956 = vmatprep.subr.bf16.mxu0 %v6243_v12  ;;  %4987 = vmatpush3.msra.mxu1 %v709_v34 }
  0xef   :  { %4989 = vmatmul.mubr.msk.f32.vlgmr.msra.gmra.mrb[0].mxu1 %vm42_vm2, %v6631_v20  ;;  %5743 = vmatprep.subr.bf16.mxu1 %v6243_v12 }
  0xf0   :  { %5745 = vmatpush3.bf16.msra.mxu1 %v5744_v55  ;;  %5005 = vmatprep.mubr.msk.f32.mxu1 %vm6246_vm1, %v6247_v61 }
  0xf1   :  { %5958 = vmatpush3.bf16.msra.mxu0 %v5957_v44  ;;  %5746 = vmatprep.subr.bf16.mxu1 %v6243_v12 }
  0xf2   :  { %5394 = vmatprep.subr.mxu0 %v6247_v61 }
  0xf4   :  { %5748 = vmatpush3.bf16.msra.mxu1 %v5747_v22  ;;  %v1217_v22 = vsub.f32 %v6985_v53, %v1216_v46 }
  0xf5   :  { %5395 = vmatpush3.msra.mxu0 %v2888_v50  ;;  %5749 = vmatprep.subr.bf16.mxu1 %v6243_v12  ;;  %v4455_v50 = vld [vmem:[%s7631_s1 + $0x178] sm:$0xff] }
  0xf6   :  { %5397 = vmatmul.mubr.msk.f32.vlgmr.msra.gmra.mrb[0].mxu0 %vm42_vm2, %v6678_v14  ;;  %5959 = vmatprep.subr.bf16.mxu0 %v6243_v12  ;;  %v1218_v32 = vand.u32 4294901760, %v1217_v22 }
  0xf7   :  { %5961 = vmatpush3.bf16.msra.mxu0 %v5960_v23  ;;  %5413 = vmatprep.mubr.msk.f32.mxu0 %vm6246_vm1, %v6247_v61 }
  0xf8   :  { %5962 = vmatprep.subr.bf16.mxu0 %v6243_v12  ;;  %5751 = vmatpush3.bf16.msra.mxu1 %v5750_v13 }
  0xf9   :  { %5003 = vmatprep.subr.mxu1 %v6247_v61 }
  0xfb   :  { %5964 = vmatpush3.bf16.msra.mxu0 %v5963_v24 }
  0xfc   :  { %5965 = vmatprep.subr.bf16.mxu0 %v6243_v12  ;;  %5004 = vmatpush3.msra.mxu1 %v6766_v45  ;;  %v3305_v45 = vand.u32 4294901760, %v4450_v35 }
  0xfd   :  { %5006 = vmatmul.mubr.f32.vlgmr.msra.gmra.mrb[0].mxu1 %v6675_v11  ;;  %5752 = vmatprep.subr.bf16.mxu1 %v6243_v12  ;;  %v5768_v11 = vpack.c.bf16 %v700_v30, %v693_v27  ;;  %v1131_v27 = vand.u32 4294901760, %v4408_v28 }
  0xfe   :  { %5754 = vmatpush3.bf16.msra.mxu1 %v6665_v54  ;;  %5022 = vmatprep.mubr.msk.f32.mxu1 %vm6246_vm1, %v6247_v61  ;;  %v7019_v26 = vsub.f32 %v4450_v35, %v3305_v45 }
  0xff   :  { %5967 = vmatpush3.bf16.msra.mxu0 %v5966_v18  ;;  %5755 = vmatprep.subr.bf16.mxu1 %v6243_v12  ;;  %v7003_v10 = vsub.f32 %v4408_v28, %v1131_v27 }
 0x100   :  { %5411 = vmatprep.subr.mxu0 %v6247_v61  ;;  %v3389_v18 = vand.u32 4294901760, %v7019_v26 }
 0x101   :  { %v1223_v44 = vand.u32 4294901760, %v7003_v10 }
 0x102   :  { %5757 = vmatpush3.bf16.msra.mxu1 %v6699_v56  ;;  %v3390_v35 = vsub.f32 %v7019_v26, %v3389_v18 }
 0x103   :  { %5412 = vmatpush3.msra.mxu0 %v6816_v21  ;;  %5758 = vmatprep.subr.bf16.mxu1 %v6243_v12  ;;  %v4412_v21 = vld [vmem:[%s7631_s1 + $0xa0] sm:$0x3] }
 0x104   :  { %5414 = vmatmul.mubr.f32.vlgmr.msra.gmra.mrb[0].mxu0 %v6731_v42  ;;  %5968 = vmatprep.subr.bf16.mxu0 %v6243_v12  ;;  %v4410_v42 = vld [vmem:[%s7631_s1 + $0x90] sm:$0xff]  ;;  %v1122_v8 = vsel %vm46_vm0, %v4412_v21, 0  ;;  %v1245_v21 = vsub.f32 %v7046_v60, %v1244_v19 }
 0x105   :  { %5970 = vmatpush3.bf16.msra.mxu0 %v6703_v59  ;;  %5430 = vmatprep.mubr.msk.f32.mxu0 %vm6246_vm1, %v6247_v61  ;;  %v1137_v51 = vand.u32 4294901760, %v4410_v42 }
 0x106   :  { %5971 = vmatprep.subr.bf16.mxu0 %v6243_v12  ;;  %5760 = vmatpush3.bf16.msra.mxu1 %v6705_v58 }
 0x107   :  { %5020 = vmatprep.subr.mxu1 %v6247_v61  ;;  %v7044_v55 = vsub.f32 %v4410_v42, %v1137_v51 }
 0x109   :  { %5973 = vmatpush3.bf16.msra.mxu0 %v6733_v43 }
 0x10a   :  { %5974 = vmatprep.subr.bf16.mxu0 %v6243_v12  ;;  %5021 = vmatpush3.msra.mxu1 %v6743_v63 }
 0x10b   :  { %5023 = vmatmul.mubr.f32.vlgmr.msra.gmra.mrb[0].mxu1 %v654_v2  ;;  %5761 = vmatprep.subr.bf16.mxu1 %v6243_v12  ;;  %v6957_v2 = vsel %vm1107_vm7, 1.0, %v6247_v61 }
 0x10c   :  { %5763 = vmatpush3.bf16.msra.mxu1 %v5762_v25  ;;  %5039 = vmatprep.mubr.msk.f32.mxu1 %vm6246_vm1, %v6247_v61  ;;  %v1119_v7 = vsel %vm42_vm2, %v6957_v2, 0 }
 0x10d   :  { %5976 = vmatpush3.bf16.msra.mxu0 %v6785_v1  ;;  %5764 = vmatprep.subr.bf16.mxu1 %v6243_v12  ;;  %v7001_v57 = vsub.f32 %v1119_v7, %v1119_v7 }
 0x10e   :  { %5428 = vmatprep.subr.mxu0 %v6247_v61 }
 0x110   :  { %5766 = vmatpush3.bf16.msra.mxu1 %v5765_v47 }
 0x111   :  { %5429 = vmatpush3.msra.mxu0 %v6809_v29  ;;  %5767 = vmatprep.subr.bf16.mxu1 %v6243_v12 }
 0x112   :  { %5431 = vmatmul.mubr.f32.vlgmr.msra.gmra.mrb[0].mxu0 %v2833_v38  ;;  %5977 = vmatprep.subr.bf16.mxu0 %v6243_v12 }
 0x113   :  { %5979 = vmatpush3.bf16.msra.mxu0 %v5978_v48  ;;  %5447 = vmatprep.mubr.msk.f32.mxu0 %vm6246_vm1, %v6247_v61  ;;  %v7067_v48 = vsub.f32 %v4453_v36, %v3314_v5 }
 0x114   :  { %5980 = vmatprep.subr.bf16.mxu0 %v6243_v12  ;;  %5769 = vmatpush3.bf16.msra.mxu1 %v5768_v11  ;;  %v7069_v11 = vand.u32 4294901760, %v1122_v8 }
 0x115   :  { %5037 = vmatprep.subr.mxu1 %v6247_v61 }
 0x116   :  { %v7092_v28 = vsub.f32 %v1122_v8, %v7069_v11 }
 0x117   :  { %5982 = vmatpush3.bf16.msra.mxu0 %v5981_v39 }
 0x118   :  { %5983 = vmatprep.subr.bf16.mxu0 %v6243_v12  ;;  %5038 = vmatpush3.msra.mxu1 %v707_v3 }
 0x119   :  { %5040 = vmatmul.mubr.msk.f32.vlgmr.msra.gmra.mrb[0].mxu1 %vm42_vm2, %v6631_v20  ;;  %5770 = vmatprep.subr.bf16.mxu1 %v6243_v12 }
 0x11a   :  { %5772 = vmatpush3.bf16.msra.mxu1 %v6665_v54  ;;  %5056 = vmatprep.mubr.msk.f32.mxu1 %vm6246_vm1, %v6247_v61  ;;  %v1125_v54 = vand.u32 4294901760, %v4406_v17 }
 0x11b   :  { %5985 = vmatpush3.bf16.msra.mxu0 %v5984_v15  ;;  %5773 = vmatprep.subr.bf16.mxu1 %v6243_v12  ;;  %v3320_v15 = vand.u32 4294901760, %v4455_v50 }
 0x11c   :  { %5445 = vmatprep.subr.mxu0 %v6247_v61  ;;  %v6971_v40 = vsub.f32 %v4406_v17, %v1125_v54  ;;  %v6991_v9 = vpack.c.bf16 %v1128_v33, %v1125_v54  ;;  %v1224_v17 = vsub.f32 %v7003_v10, %v1223_v44  ;;  %v1237_v33 = vand.u32 4294901760, %v7044_v55 }
 0x11d   :  { %v7106_v41 = vsub.f32 %v4455_v50, %v3320_v15 }
 0x11e   :  { %5775 = vmatpush3.bf16.msra.mxu1 %v6699_v56  ;;  %v4409_v56 = vld [vmem:[%s7631_s1 + $0x88] sm:$0xff]  ;;  %v1209_v0 = vand.u32 4294901760, %v6971_v40  ;;  %v1238_v36 = vsub.f32 %v7044_v55, %v1237_v33 }
 0x11f   :  { %5446 = vmatpush3.msra.mxu0 %v2886_v31  ;;  %5776 = vmatprep.subr.bf16.mxu1 %v6243_v12  ;;  %v1134_v30 = vand.u32 4294901760, %v4409_v56  ;;  %v1198_v31 = vand.u32 4294901760, %v7001_v57  ;;  %v3424_v50 = vand.u32 4294901760, %v7106_v41 }
 0x120   :  { %5448 = vmatmul.mubr.msk.f32.vlgmr.msra.gmra.mrb[0].mxu0 %vm42_vm2, %v6678_v14  ;;  %5986 = vmatprep.subr.bf16.mxu0 %v6243_v12  ;;  %v1210_v34 = vsub.f32 %v6971_v40, %v1209_v0 }
 0x121   :  { %5988 = vmatpush3.bf16.msra.mxu0 %v6703_v59  ;;  %5464 = vmatprep.mubr.msk.f32.mxu0 %vm6246_vm1, %v6247_v61  ;;  %v4451_v59 = vld [vmem:[%s7631_s1 + $0x158] sm:$0xff]  ;;  %v7010_v3 = vsub.f32 %v4409_v56, %v1134_v30  ;;  %v1199_v16 = vsub.f32 %v7001_v57, %v1198_v31 }
 0x122   :  { %5989 = vmatprep.subr.bf16.mxu0 %v6243_v12  ;;  %5778 = vmatpush3.bf16.msra.mxu1 %v6705_v58  ;;  %v3308_v38 = vand.u32 4294901760, %v4451_v59  ;;  %v4452_v58 = vld [vmem:[%s7631_s1 + $0x160] sm:$0xff] }
 0x123   :  { %5054 = vmatprep.subr.mxu1 %v6247_v61  ;;  %v3311_v4 = vand.u32 4294901760, %v4452_v58  ;;  %v1230_v23 = vand.u32 4294901760, %v7010_v3 }
 0x124   :  { %v7021_v62 = vsub.f32 %v4451_v59, %v3308_v38  ;;  %v7027_v6 = vpack.c.bf16 %v3308_v38, %v3305_v45  ;;  %v1200_v45 = vand.u32 4294901760, %v1199_v16  ;;  %v1246_v16 = vand.u32 4294901760, %v1245_v21 }
 0x125   :  { %5991 = vmatpush3.bf16.msra.mxu0 %v6733_v43  ;;  %v7006_v43 = vsel %vm3287_vm8, 1.0, %v6247_v61  ;;  %v7059_v24 = vpack.c.bf16 %v3314_v5, %v3311_v4  ;;  %v7065_v47 = vsub.f32 %v4452_v58, %v3311_v4  ;;  %v1231_v54 = vsub.f32 %v7010_v3, %v1230_v23 }
 0x126   :  { %5992 = vmatprep.subr.bf16.mxu0 %v6243_v12  ;;  %5055 = vmatpush3.msra.mxu1 %v6743_v63  ;;  %v7025_v63 = vpack.c.bf16 %v1134_v30, %v1131_v27  ;;  %v3299_v49 = vsel %vm42_vm2, %v7006_v43, 0  ;;  %v3396_v25 = vand.u32 4294901760, %v7021_v62  ;;  %v3410_v27 = vand.u32 4294901760, %v7067_v48 }
 0x127   :  { %5057 = vmatmul.mubr.msk.f32.vlgmr.msra.gmra.mrb[0].mxu1 %vm42_vm2, %v6631_v20  ;;  %5779 = vmatprep.subr.bf16.mxu1 %v6243_v12  ;;  %v7031_v20 = vpack.c.bf16 %v1140_v52, %v1137_v51  ;;  %v7057_v13 = vsub.f32 %v3299_v49, %v3299_v49  ;;  %v3403_v7 = vand.u32 4294901760, %v7065_v47  ;;  %v1225_v51 = vand.u32 4294901760, %v1224_v17 }
 0x128   :  { %5781 = vmatpush3.bf16.msra.mxu1 %v6991_v9  ;;  %5073 = vmatprep.mubr.msk.f32.mxu1 %vm6246_vm1, %v6247_v61  ;;  %v3397_v59 = vsub.f32 %v7021_v62, %v3396_v25  ;;  %v1232_v58 = vand.u32 4294901760, %v1231_v54  ;;  %v3391_v5 = vand.u32 4294901760, %v3390_v35 }
 0x129   :  { %5994 = vmatpush3.bf16.msra.mxu0 %v6785_v1  ;;  %5782 = vmatprep.subr.bf16.mxu1 %v6243_v12  ;;  %v4454_v1 = vld [vmem:[%s7631_s1 + $0x170] sm:$0xff]  ;;  %v3378_v56 = vand.u32 4294901760, %v7057_v13  ;;  %v3404_v8 = vsub.f32 %v7065_v47, %v3403_v7 }
 0x12a   :  { %5462 = vmatprep.subr.mxu0 %v6247_v61  ;;  %v3317_v39 = vand.u32 4294901760, %v4454_v1  ;;  %v3398_v49 = vand.u32 4294901760, %v3397_v59 }
 0x12b   :  { %v3379_v4 = vsub.f32 %v7057_v13, %v3378_v56  ;;  %v3405_v54 = vand.u32 4294901760, %v3404_v8 }
 0x12c   :  { %5784 = vmatpush3.bf16.msra.mxu1 %v7025_v63  ;;  %v7104_v42 = vsub.f32 %v4454_v1, %v3317_v39  ;;  %v7111_v30 = vpack.c.bf16 %v3320_v15, %v3317_v39  ;;  %v3411_v1 = vsub.f32 %v7067_v48, %v3410_v27  ;;  %v5792_v39 = vpack.c.bf16 %v1232_v58, %v1225_v51 }
 0x12d   :  { %5463 = vmatpush3.msra.mxu0 %v6809_v29  ;;  %v1211_v29 = vand.u32 4294901760, %v1210_v34  ;;  %5785 = vmatprep.subr.bf16.mxu1 %v6243_v12  ;;  %v1239_v15 = vand.u32 4294901760, %v1238_v36 }
 0x12e   :  { %5465 = vmatmul.mubr.msk.f32.vlgmr.msra.gmra.mrb[0].mxu0 %vm42_vm2, %v6678_v14  ;;  %5995 = vmatprep.subr.bf16.mxu0 %v6243_v12  ;;  %v4456_v14 = vld [vmem:[%s7631_s1 + $0x180] sm:$0x3]  ;;  %v3417_v34 = vand.u32 4294901760, %v7104_v42  ;;  %v3412_v35 = vand.u32 4294901760, %v3411_v1 }
 0x12f   :  { %5997 = vmatpush3.bf16.msra.mxu0 %v7027_v6  ;;  %5481 = vmatprep.mubr.msk.f32.mxu0 %vm6246_vm1, %v6247_v61  ;;  %v3302_v38 = vsel %vm46_vm0, %v4456_v14, 0  ;;  %v5789_v52 = vpack.c.bf16 %v1218_v32, %v1211_v29  ;;  %v1251_v29 = vand.u32 4294901760, %v7092_v28  ;;  %v3380_v32 = vand.u32 4294901760, %v3379_v4 }
 0x130   :  { %5998 = vmatprep.subr.bf16.mxu0 %v6243_v12  ;;  %5787 = vmatpush3.bf16.msra.mxu1 %v7031_v20  ;;  %v7135_v22 = vand.u32 4294901760, %v3302_v38  ;;  %v6005_v14 = vpack.c.bf16 %v3398_v49, %v3391_v5  ;;  %v3418_v59 = vsub.f32 %v7104_v42, %v3417_v34  ;;  %v5798_v49 = vpack.c.bf16 %v6985_v53, %v6971_v40 }
 0x131   :  { %5071 = vmatprep.subr.mxu1 %v6247_v61  ;;  %v1252_v51 = vsub.f32 %v7092_v28, %v1251_v29  ;;  %v5819_v40 = vpack.c.bf16 %v1230_v23, %v1223_v44  ;;  %v6032_v53 = vpack.c.bf16 %v3396_v25, %v3389_v18  ;;  %v4419_v44 = vld [vmem:[%s7631_s1 + $0xb8] sm:$0xff]  ;;  %v4461_v23 = vld [vmem:[%s7631_s1 + $0x188] sm:$0xff] }
 0x132   :  { %v7142_v17 = vsub.f32 %v3302_v38, %v7135_v22  ;;  %v5795_v38 = vpack.c.bf16 %v1246_v16, %v1239_v15  ;;  %v3419_v58 = vand.u32 4294901760, %v3418_v59  ;;  %v6014_v15 = vpack.c.bf16 %v7021_v62, %v7019_v26  ;;  %v4418_v26 = vld [vmem:[%s7631_s1 + $0xb0] sm:$0xff] }
 0x133   :  { %6000 = vmatpush3.bf16.msra.mxu0 %v7059_v24  ;;  %v1253_v4 = vand.u32 4294901760, %v1252_v51  ;;  %v5804_v16 = vpack.c.bf16 %v7046_v60, %v7044_v55  ;;  %v4420_v55 = vld [vmem:[%s7631_s1 + $0xc0] sm:$0xff] }
 0x134   :  { %6001 = vmatprep.subr.bf16.mxu0 %v6243_v12  ;;  %5072 = vmatpush3.msra.mxu1 %v7069_v11  ;;  %v3431_v21 = vand.u32 4294901760, %v7142_v17 }
 0x135   :  { %5788 = vmatprep.subr.bf16.mxu1 %v6243_v12  ;;  %5074 = vmatmul.mubr.f32.vlgmr.msra.gmra.mrb[0].mxu1 %v1200_v45  ;;  %v3425_v45 = vsub.f32 %v7106_v41, %v3424_v50 }
 0x136   :  { %5790 = vmatpush3.bf16.msra.mxu1 %v5789_v52  ;;  %5090 = vmatprep.mubr.msk.f32.mxu1 %vm6246_vm1, %v6247_v61  ;;  %v6008_v52 = vpack.c.bf16 %v3412_v35, %v3405_v54  ;;  %v3432_v8 = vsub.f32 %v7142_v17, %v3431_v21  ;;  %v5816_v54 = vpack.c.bf16 %v1216_v46, %v1209_v0  ;;  %v4417_v46 = vld [vmem:[%s7631_s1 + $0xa8] sm:$0xff] }
 0x137   :  { %6003 = vmatpush3.bf16.msra.mxu0 %v7111_v30  ;;  %5791 = vmatprep.subr.bf16.mxu1 %v6243_v12  ;;  %v3426_v36 = vand.u32 4294901760, %v3425_v45  ;;  %v6038_v0 = vpack.c.bf16 %v3424_v50, %v3417_v34 }
 0x138   :  { %5479 = vmatprep.subr.mxu0 %v6247_v61  ;;  %v3433_v1 = vand.u32 4294901760, %v3432_v8  ;;  %v4466_v8 = vld [vmem:[%s7631_s1 + $0x1b0] sm:$0xff] }
 0x139   :  { %v6011_v5 = vpack.c.bf16 %v3426_v36, %v3419_v58 }
 0x13a   :  { %5793 = vmatpush3.bf16.msra.mxu1 %v5792_v39  ;;  %v5801_v39 = vpack.c.bf16 %v7010_v3, %v7003_v10  ;;  %v6035_v10 = vpack.c.bf16 %v3410_v27, %v3403_v7  ;;  %v1651_v3 = vpop.permute.xlu1 %1650  ;;  %v4464_v27 = vld [vmem:[%s7631_s1 + $0x1a0] sm:$0xff] }
 0x13b   :  { %5480 = vmatpush3.msra.mxu0 %v7135_v22  ;;  %5794 = vmatprep.subr.bf16.mxu1 %v6243_v12  ;;  %vm1652_vm9 = vcmp.eq.s32.totalorder %v1651_v3, %v6470_v37  ;;  %v3859_v58 = vand.u32 4294901760, %v4464_v27 }
 0x13c   :  { %5482 = vmatmul.mubr.f32.vlgmr.msra.gmra.mrb[0].mxu0 %v3380_v32  ;;  %6004 = vmatprep.subr.bf16.mxu0 %v6243_v12  ;;  %v6017_v32 = vpack.c.bf16 %v7067_v48, %v7065_v47  ;;  %v7277_v62 = vsel %vm1652_vm9, 1.0, %v6247_v61  ;;  %v4422_v47 = vld [vmem:[%s7631_s1 + $0xd0] sm:$0xff]  ;;  %v1676_v48 = vand.u32 4294901760, %v4419_v44 }
 0x13d   :  { %6006 = vmatpush3.bf16.msra.mxu0 %v6005_v14  ;;  %5498 = vmatprep.mubr.msk.f32.mxu0 %vm6246_vm1, %v6247_v61  ;;  %v6020_v14 = vpack.c.bf16 %v7106_v41, %v7104_v42  ;;  %v1685_v7 = vand.u32 4294901760, %v4422_v47 }
 0x13e   :  { %6007 = vmatprep.subr.bf16.mxu0 %v6243_v12  ;;  %5796 = vmatpush3.bf16.msra.mxu1 %v5795_v38  ;;  %v3831_v60 = vpop.permute.xlu1 %3830 }
 0x13f   :  { %5088 = vmatprep.subr.mxu1 %v6247_v61  ;;  %vm3832_vm10 = vcmp.eq.s32.totalorder %v3831_v60, %v6470_v37  ;;  %v4463_v37 = vld [vmem:[%s7631_s1 + $0x198] sm:$0xff] }
 0x141   :  { %6009 = vmatpush3.bf16.msra.mxu0 %v6008_v52  ;;  %v3856_v52 = vand.u32 4294901760, %v4463_v37 }
 0x142   :  { %6010 = vmatprep.subr.bf16.mxu0 %v6243_v12  ;;  %5089 = vmatpush3.msra.mxu1 %v1253_v4 }
 0x143   :  { %5091 = vmatmul.mubr.msk.f32.vlgmr.msra.gmra.mrb[0].mxu1 %vm42_vm2, %v6957_v2  ;;  %5797 = vmatprep.subr.bf16.mxu1 %v6243_v12 }
 0x144   :  { %5799 = vmatpush3.bf16.msra.mxu1 %v5798_v49  ;;  %5107 = vmatprep.mubr.msk.f32.mxu1 %vm6246_vm1, %v6247_v61 }
 0x145   :  { %6012 = vmatpush3.bf16.msra.mxu0 %v6011_v5  ;;  %5800 = vmatprep.subr.bf16.mxu1 %v6243_v12  ;;  %v7373_v5 = vsub.f32 %v4422_v47, %v1685_v7 }
 0x146   :  { %5496 = vmatprep.subr.mxu0 %v6247_v61 }
 0x148   :  { %5802 = vmatpush3.bf16.msra.mxu1 %v5801_v39 }
 0x149   :  { %5497 = vmatpush3.msra.mxu0 %v3433_v1  ;;  %5803 = vmatprep.subr.bf16.mxu1 %v6243_v12 }
 0x14a   :  { %5499 = vmatmul.mubr.msk.f32.vlgmr.msra.gmra.mrb[0].mxu0 %vm42_vm2, %v7006_v43  ;;  %6013 = vmatprep.subr.bf16.mxu0 %v6243_v12 }
 0x14b   :  { %6015 = vmatpush3.bf16.msra.mxu0 %v6014_v15  ;;  %5515 = vmatprep.mubr.msk.f32.mxu0 %vm6246_vm1, %v6247_v61 }
 0x14c   :  { %6016 = vmatprep.subr.bf16.mxu0 %v6243_v12  ;;  %5805 = vmatpush3.bf16.msra.mxu1 %v5804_v16 }
 0x14d   :  { %5105 = vmatprep.subr.mxu1 %v6247_v61 }
 0x14f   :  { %6018 = vmatpush3.bf16.msra.mxu0 %v6017_v32 }
 0x150   :  { %6019 = vmatprep.subr.bf16.mxu0 %v6243_v12  ;;  %5106 = vmatpush3.msra.mxu1 %v7092_v28  ;;  %v3850_v28 = vand.u32 4294901760, %v4461_v23 }
 0x151   :  { %5108 = vmatmul.mubr.f32.vlgmr.msra.gmra.mrb[0].mxu1 %v7001_v57  ;;  %5806 = vmatprep.subr.bf16.mxu1 %v6243_v12  ;;  %v5822_v57 = vpack.c.bf16 %v1244_v19, %v1237_v33  ;;  %v1679_v33 = vand.u32 4294901760, %v4420_v55 }
 0x152   :  { %5808 = vmatpush3.bf16.msra.mxu1 %v6991_v9  ;;  %5124 = vmatprep.mubr.msk.f32.mxu1 %vm6246_vm1, %v6247_v61  ;;  %v7346_v59 = vsub.f32 %v4461_v23, %v3850_v28 }
 0x153   :  { %6021 = vmatpush3.bf16.msra.mxu0 %v6020_v14  ;;  %5809 = vmatprep.subr.bf16.mxu1 %v6243_v12  ;;  %v7335_v50 = vpack.c.bf16 %v1679_v33, %v1676_v48 }
 0x154   :  { %5513 = vmatprep.subr.mxu0 %v6247_v61  ;;  %v3934_v32 = vand.u32 4294901760, %v7346_v59 }
 0x156   :  { %5811 = vmatpush3.bf16.msra.mxu1 %v7025_v63  ;;  %v3935_v60 = vsub.f32 %v7346_v59, %v3934_v32 }
 0x157   :  { %5514 = vmatpush3.msra.mxu0 %v7142_v17  ;;  %5812 = vmatprep.subr.bf16.mxu1 %v6243_v12  ;;  %v7339_v17 = vsub.f32 %v4420_v55, %v1679_v33 }
 0x158   :  { %5516 = vmatmul.mubr.f32.vlgmr.msra.gmra.mrb[0].mxu0 %v7057_v13  ;;  %6022 = vmatprep.subr.bf16.mxu0 %v6243_v12  ;;  %v4462_v13 = vld [vmem:[%s7631_s1 + $0x190] sm:$0xff] }
 0x159   :  { %6024 = vmatpush3.bf16.msra.mxu0 %v7027_v6  ;;  %5532 = vmatprep.mubr.msk.f32.mxu0 %vm6246_vm1, %v6247_v61  ;;  %v1775_v39 = vand.u32 4294901760, %v7339_v17 }
 0x15a   :  { %6025 = vmatprep.subr.bf16.mxu0 %v6243_v12  ;;  %5814 = vmatpush3.bf16.msra.mxu1 %v7031_v20 }
 0x15b   :  { %5122 = vmatprep.subr.mxu1 %v6247_v61 }
 0x15d   :  { %6027 = vmatpush3.bf16.msra.mxu0 %v7059_v24 }
 0x15e   :  { %6028 = vmatprep.subr.bf16.mxu0 %v6243_v12  ;;  %5123 = vmatpush3.msra.mxu1 %v7069_v11 }
 0x15f   :  { %5125 = vmatmul.mubr.f32.vlgmr.msra.gmra.mrb[0].mxu1 %v1198_v31  ;;  %5815 = vmatprep.subr.bf16.mxu1 %v6243_v12  ;;  %v1673_v31 = vand.u32 4294901760, %v4418_v26 }
 0x160   :  { %5817 = vmatpush3.bf16.msra.mxu1 %v5816_v54  ;;  %5141 = vmatprep.mubr.msk.f32.mxu1 %vm6246_vm1, %v6247_v61  ;;  %v7392_v54 = vpack.c.bf16 %v3859_v58, %v3856_v52 }
 0x161   :  { %6030 = vmatpush3.bf16.msra.mxu0 %v7111_v30  ;;  %5818 = vmatprep.subr.bf16.mxu1 %v6243_v12  ;;  %v7304_v25 = vsub.f32 %v4418_v26, %v1673_v31 }
 0x162   :  { %5530 = vmatprep.subr.mxu0 %v6247_v61 }
 0x164   :  { %5820 = vmatpush3.bf16.msra.mxu1 %v5819_v40  ;;  %v7394_v40 = vsub.f32 %v4463_v37, %v3856_v52 }
 0x165   :  { %5531 = vmatpush3.msra.mxu0 %v7135_v22  ;;  %5821 = vmatprep.subr.bf16.mxu1 %v6243_v12 }
 0x166   :  { %5533 = vmatmul.mubr.f32.vlgmr.msra.gmra.mrb[0].mxu0 %v3378_v56  ;;  %6031 = vmatprep.subr.bf16.mxu0 %v6243_v12  ;;  %v3853_v56 = vand.u32 4294901760, %v4462_v13 }
 0x167   :  { %6033 = vmatpush3.bf16.msra.mxu0 %v6032_v53  ;;  %5549 = vmatprep.mubr.msk.f32.mxu0 %vm6246_vm1, %v6247_v61  ;;  %v7396_v53 = vsub.f32 %v4464_v27, %v3859_v58 }
 0x168   :  { %6034 = vmatprep.subr.bf16.mxu0 %v6243_v12  ;;  %5823 = vmatpush3.bf16.msra.mxu1 %v5822_v57  ;;  %v7344_v35 = vpack.c.bf16 %v3853_v56, %v3850_v28  ;;  %v7348_v45 = vsub.f32 %v4462_v13, %v3853_v56 }
 0x169   :  { %5139 = vmatprep.subr.mxu1 %v6247_v61  ;;  %v3955_v47 = vand.u32 4294901760, %v7396_v53 }
 0x16a   :  { %v3941_v14 = vand.u32 4294901760, %v7348_v45 }
 0x16b   :  { %6036 = vmatpush3.bf16.msra.mxu0 %v6035_v10 }
 0x16c   :  { %6037 = vmatprep.subr.bf16.mxu0 %v6243_v12  ;;  %5140 = vmatpush3.msra.mxu1 %v1251_v29  ;;  %v7337_v29 = vsub.f32 %v4419_v44, %v1676_v48 }
 0x16d   :  { %5142 = vmatmul.mubr.msk.f32.vlgmr.msra.gmra.mrb[0].mxu1 %vm42_vm2, %v6957_v2  ;;  %5824 = vmatprep.subr.bf16.mxu1 %v6243_v12 }
 0x16e   :  { %5826 = vmatpush3.bf16.msra.mxu1 %v6991_v9  ;;  %5158 = vmatprep.mubr.msk.f32.mxu1 %vm6246_vm1, %v6247_v61  ;;  %v1670_v9 = vand.u32 4294901760, %v4417_v46  ;;  %v1768_v1 = vand.u32 4294901760, %v7337_v29 }
 0x16f   :  { %6039 = vmatpush3.bf16.msra.mxu0 %v6038_v0  ;;  %5827 = vmatprep.subr.bf16.mxu1 %v6243_v12  ;;  %v3865_v0 = vand.u32 4294901760, %v4466_v8 }
 0x170   :  { %5547 = vmatprep.subr.mxu0 %v6247_v61  ;;  %v7302_v18 = vsub.f32 %v4417_v46, %v1670_v9  ;;  %v7320_v42 = vpack.c.bf16 %v1673_v31, %v1670_v9  ;;  %v1769_v26 = vsub.f32 %v7337_v29, %v1768_v1  ;;  %v1789_v31 = vand.u32 4294901760, %v7373_v5 }
 0x171   :  { %v7429_v13 = vsub.f32 %v4466_v8, %v3865_v0 }
 0x172   :  { %5829 = vmatpush3.bf16.msra.mxu1 %v7025_v63  ;;  %v1664_v63 = vsel %vm42_vm2, %v7277_v62, 0  ;;  %v1754_v34 = vand.u32 4294901760, %v7302_v18  ;;  %v1790_v27 = vsub.f32 %v7373_v5, %v1789_v31 }
 0x173   :  { %5548 = vmatpush3.msra.mxu0 %v3431_v21  ;;  %5830 = vmatprep.subr.bf16.mxu1 %v6243_v12  ;;  %v7317_v19 = vsub.f32 %v1664_v63, %v1664_v63  ;;  %v4465_v21 = vld [vmem:[%s7631_s1 + $0x1a8] sm:$0xff]  ;;  %v3942_v63 = vsub.f32 %v7348_v45, %v3941_v14 }
 0x174   :  { %5550 = vmatmul.mubr.msk.f32.vlgmr.msra.gmra.mrb[0].mxu0 %vm42_vm2, %v7006_v43  ;;  %6040 = vmatprep.subr.bf16.mxu0 %v6243_v12  ;;  %v3862_v57 = vand.u32 4294901760, %v4465_v21 }
 0x175   :  { %6042 = vmatpush3.bf16.msra.mxu0 %v7027_v6  ;;  %5566 = vmatprep.mubr.msk.f32.mxu0 %vm6246_vm1, %v6247_v61  ;;  %v4421_v6 = vld [vmem:[%s7631_s1 + $0xc8] sm:$0xff]  ;;  %v1743_v38 = vand.u32 4294901760, %v7317_v19  ;;  %v3943_v52 = vand.u32 4294901760, %v3942_v63 }
 0x176   :  { %6043 = vmatprep.subr.bf16.mxu0 %v6243_v12  ;;  %5832 = vmatpush3.bf16.msra.mxu1 %v7031_v20  ;;  %v1682_v41 = vand.u32 4294901760, %v4421_v6  ;;  %v7324_v20 = vsel %vm3832_vm10, 1.0, %v6247_v61  ;;  %v7427_v23 = vsub.f32 %v4465_v21, %v3862_v57  ;;  %v7437_v33 = vpack.c.bf16 %v3865_v0, %v3862_v57 }
 0x177   :  { %5156 = vmatprep.subr.mxu1 %v6247_v61  ;;  %v1744_v16 = vsub.f32 %v7317_v19, %v1743_v38  ;;  %v3956_v21 = vsub.f32 %v7396_v53, %v3955_v47  ;;  %v1791_v57 = vand.u32 4294901760, %v1790_v27 }
 0x178   :  { %v7358_v51 = vpack.c.bf16 %v1685_v7, %v1682_v41  ;;  %v7362_v36 = vsub.f32 %v4421_v6, %v1682_v41  ;;  %v3948_v6 = vand.u32 4294901760, %v7394_v40  ;;  %v1770_v41 = vand.u32 4294901760, %v1769_v26 }
 0x179   :  { %6045 = vmatpush3.bf16.msra.mxu0 %v7059_v24  ;;  %v1761_v24 = vand.u32 4294901760, %v7304_v25  ;;  %v1745_v44 = vand.u32 4294901760, %v1744_v16 }
 0x17a   :  { %6046 = vmatprep.subr.bf16.mxu0 %v6243_v12  ;;  %5157 = vmatpush3.msra.mxu1 %v7069_v11  ;;  %v4423_v11 = vld [vmem:[%s7631_s1 + $0xd8] sm:$0x3]  ;;  %v1782_v9 = vand.u32 4294901760, %v7362_v36  ;;  %v3949_v58 = vsub.f32 %v7394_v40, %v3948_v6 }
 0x17b   :  { %5159 = vmatmul.mubr.msk.f32.vlgmr.msra.gmra.mrb[0].mxu1 %vm42_vm2, %v6957_v2  ;;  %5833 = vmatprep.subr.bf16.mxu1 %v6243_v12  ;;  %v3844_v2 = vsel %vm42_vm2, %v7324_v20, 0  ;;  %v1762_v4 = vsub.f32 %v7304_v25, %v1761_v24  ;;  %v1667_v49 = vsel %vm46_vm0, %v4423_v11, 0 }
 0x17c   :  { %5835 = vmatpush3.bf16.msra.mxu1 %v7320_v42  ;;  %5175 = vmatprep.mubr.msk.f32.mxu1 %vm6246_vm1, %v6247_v61  ;;  %v7383_v15 = vsub.f32 %v3844_v2, %v3844_v2  ;;  %v7401_v10 = vand.u32 4294901760, %v1667_v49  ;;  %v1783_v37 = vsub.f32 %v7362_v36, %v1782_v9  ;;  %v3936_v2 = vand.u32 4294901760, %v3935_v60 }
 0x17d   :  { %6048 = vmatpush3.bf16.msra.mxu0 %v7111_v30  ;;  %5836 = vmatprep.subr.bf16.mxu1 %v6243_v12  ;;  %v1755_v30 = vsub.f32 %v7302_v18, %v1754_v34  ;;  %v1763_v46 = vand.u32 4294901760, %v1762_v4  ;;  %v3969_v4 = vand.u32 4294901760, %v7429_v13  ;;  %v3950_v26 = vand.u32 4294901760, %v3949_v58 }
 0x17e   :  { %5564 = vmatprep.subr.mxu0 %v6247_v61  ;;  %v3923_v55 = vand.u32 4294901760, %v7383_v15  ;;  %v7435_v48 = vsub.f32 %v1667_v49, %v7401_v10  ;;  %v1784_v16 = vand.u32 4294901760, %v1783_v37 }
 0x17f   :  { %v1756_v3 = vand.u32 4294901760, %v1755_v30  ;;  %v3962_v30 = vand.u32 4294901760, %v7427_v23  ;;  %v3970_v60 = vsub.f32 %v7429_v13, %v3969_v4 }
 0x180   :  { %5838 = vmatpush3.bf16.msra.mxu1 %v7335_v50  ;;  %v3924_v11 = vsub.f32 %v7383_v15, %v3923_v55  ;;  %v1796_v0 = vand.u32 4294901760, %v7435_v48  ;;  %v5849_v63 = vpack.c.bf16 %v1791_v57, %v1784_v16  ;;  %v5858_v16 = vpack.c.bf16 %v7373_v5, %v7362_v36 }
 0x181   :  { %5565 = vmatpush3.msra.mxu0 %v7135_v22  ;;  %5839 = vmatprep.subr.bf16.mxu1 %v6243_v12  ;;  %v4467_v22 = vld [vmem:[%s7631_s1 + $0x1b8] sm:$0x3]  ;;  %v5843_v28 = vpack.c.bf16 %v1763_v46, %v1756_v3  ;;  %v6071_v57 = vpack.c.bf16 %v7396_v53, %v7394_v40  ;;  %s6252_s1 = smov [#allocation2]  }
 0x182   :  { %5567 = vmatmul.mubr.msk.f32.vlgmr.msra.gmra.mrb[0].mxu0 %vm42_vm2, %v7006_v43  ;;  %6049 = vmatprep.subr.bf16.mxu0 %v6243_v12  ;;  %v1776_v43 = vsub.f32 %v7339_v17, %v1775_v39  ;;  %v3847_v56 = vsel %vm46_vm0, %v4467_v22, 0  ;;  %v3925_v46 = vand.u32 4294901760, %v3924_v11  ;;  %v6059_v22 = vpack.c.bf16 %v3943_v52, %v3936_v2  ;;  %s4382_s7 = sshll.u32 %s6252_s1, 4  ;;  %s4383_s7 = int_to_ptr.vmem [resolvable:$true] %s4382_s7 }
 0x183   :  { %6051 = vmatpush3.bf16.msra.mxu0 %v7344_v35  ;;  %5583 = vmatprep.mubr.msk.f32.mxu0 %vm6246_vm1, %v6247_v61  ;;  %v7461_v49 = vand.u32 4294901760, %v3847_v56  ;;  %v5852_v2 = vpack.c.bf16 %v7304_v25, %v7302_v18  ;;  %v5873_v18 = vpack.c.bf16 %v1775_v39, %v1768_v1  ;;  %v6086_v25 = vpack.c.bf16 %v3941_v14, %v3934_v32  ;;  %s6217_s8 = scalar_lea.vmem %s4383_s7, 128  ;;  %p6222_p1 = scmp.lt.s32.totalorder %s4383_s7, %s4383_s7 }
 0x184   :  { %6052 = vmatprep.subr.bf16.mxu0 %v6243_v12  ;;  %5841 = vmatpush3.bf16.msra.mxu1 %v7358_v51  ;;  %v1777_v7 = vand.u32 4294901760, %v1776_v43  ;;  %v3957_v43 = vand.u32 4294901760, %v3956_v21  ;;  %v5855_v21 = vpack.c.bf16 %v7339_v17, %v7337_v29  ;;  %p6218_p0 = scmp.ne.s32.totalorder %s4383_s7, %s6217_s8  ;;  %p6223_p2 = scmp.lt.s32.totalorder %s6217_s8, %s6217_s8 }
 0x185   :  { %5173 = vmatprep.subr.mxu1 %v6247_v61  ;;  %v7468_v3 = vsub.f32 %v3847_v56, %v7461_v49 }
 0x186   :  { %v5846_v8 = vpack.c.bf16 %v1777_v7, %v1770_v41  ;;  %v6062_v56 = vpack.c.bf16 %v3957_v43, %v3950_v26  ;;  %v3971_v7 = vand.u32 4294901760, %v3970_v60  ;;  %p6224_p3 = por %p6223_p2, %p6222_p1 }
 0x187   :  { %6054 = vmatpush3.bf16.msra.mxu0 %v7392_v54  ;;  %v3976_v37 = vand.u32 4294901760, %v7468_v3 }
 0x188   :  { %6055 = vmatprep.subr.bf16.mxu0 %v6243_v12  ;;  %5174 = vmatpush3.msra.mxu1 %v7401_v10  ;;  %p6225_p4 = pnand %p6224_p3, %p6218_p0 }
 0x189   :  { %5176 = vmatmul.mubr.f32.vlgmr.msra.gmra.mrb[0].mxu1 %v1745_v44  ;;  %5842 = vmatprep.subr.bf16.mxu1 %v6243_v12  ;;  %v3963_v44 = vsub.f32 %v7427_v23, %v3962_v30  ;;  %v3977_v52 = vsub.f32 %v7468_v3, %v3976_v37 }
 0x18a   :  { %5844 = vmatpush3.bf16.msra.mxu1 %v5843_v28  ;;  %5192 = vmatprep.mubr.msk.f32.mxu1 %vm6246_vm1, %v6247_v61  ;;  %v1797_v28 = vsub.f32 %v7435_v48, %v1796_v0 }
 0x18b   :  { %6057 = vmatpush3.bf16.msra.mxu0 %v7437_v33  ;;  %5845 = vmatprep.subr.bf16.mxu1 %v6243_v12  ;;  %v3964_v41 = vand.u32 4294901760, %v3963_v44  ;;  %v3978_v58 = vand.u32 4294901760, %v3977_v52 }
 0x18c   :  { %5581 = vmatprep.subr.mxu0 %v6247_v61  ;;  %v1798_v27 = vand.u32 4294901760, %v1797_v28 }
 0x18d   :  { %v6065_v11 = vpack.c.bf16 %v3971_v7, %v3964_v41 }
 0x18e   :  { %5847 = vmatpush3.bf16.msra.mxu1 %v5846_v8  ;;  %v6068_v8 = vpack.c.bf16 %v7348_v45, %v7346_v59 }
 0x18f   :  { %5582 = vmatpush3.msra.mxu0 %v7461_v49  ;;  %5848 = vmatprep.subr.bf16.mxu1 %v6243_v12 }
 0x190   :  { %5584 = vmatmul.mubr.f32.vlgmr.msra.gmra.mrb[0].mxu0 %v3925_v46  ;;  %6058 = vmatprep.subr.bf16.mxu0 %v6243_v12  ;;  %v6074_v46 = vpack.c.bf16 %v7429_v13, %v7427_v23 }
 0x191   :  { %6060 = vmatpush3.bf16.msra.mxu0 %v6059_v22  ;;  %5600 = vmatprep.mubr.msk.f32.mxu0 %vm6246_vm1, %v6247_v61  ;;  %v5870_v22 = vpack.c.bf16 %v1761_v24, %v1754_v34  ;;  %v6089_v34 = vpack.c.bf16 %v3955_v47, %v3948_v6  ;;  %v6092_v24 = vpack.c.bf16 %v3969_v4, %v3962_v30 }
 0x192   :  { %6061 = vmatprep.subr.bf16.mxu0 %v6243_v12  ;;  %5850 = vmatpush3.bf16.msra.mxu1 %v5849_v63 }
 0x193   :  { %5190 = vmatprep.subr.mxu1 %v6247_v61 }
 0x195   :  { %6063 = vmatpush3.bf16.msra.mxu0 %v6062_v56 }
 0x196   :  { %6064 = vmatprep.subr.bf16.mxu0 %v6243_v12  ;;  %5191 = vmatpush3.msra.mxu1 %v1798_v27 }
 0x197   :  { %5193 = vmatmul.mubr.msk.f32.vlgmr.msra.gmra.mrb[0].mxu1 %vm42_vm2, %v7277_v62  ;;  %5851 = vmatprep.subr.bf16.mxu1 %v6243_v12 }
 0x198   :  { %5853 = vmatpush3.bf16.msra.mxu1 %v5852_v2  ;;  %5209 = vmatprep.mubr.msk.f32.mxu1 %vm6246_vm1, %v6247_v61 }
 0x199   :  { %6066 = vmatpush3.bf16.msra.mxu0 %v6065_v11  ;;  %5854 = vmatprep.subr.bf16.mxu1 %v6243_v12 }
 0x19a   :  { %5598 = vmatprep.subr.mxu0 %v6247_v61 }
 0x19c   :  { %5856 = vmatpush3.bf16.msra.mxu1 %v5855_v21 }
 0x19d   :  { %5599 = vmatpush3.msra.mxu0 %v3978_v58  ;;  %5857 = vmatprep.subr.bf16.mxu1 %v6243_v12 }
 0x19e   :  { %5601 = vmatmul.mubr.msk.f32.vlgmr.msra.gmra.mrb[0].mxu0 %vm42_vm2, %v7324_v20  ;;  %6067 = vmatprep.subr.bf16.mxu0 %v6243_v12 }
 0x19f   :  { %6069 = vmatpush3.bf16.msra.mxu0 %v6068_v8  ;;  %5617 = vmatprep.mubr.msk.f32.mxu0 %vm6246_vm1, %v6247_v61 }
 0x1a0   :  { %6070 = vmatprep.subr.bf16.mxu0 %v6243_v12  ;;  %5859 = vmatpush3.bf16.msra.mxu1 %v5858_v16 }
 0x1a1   :  { %5207 = vmatprep.subr.mxu1 %v6247_v61 }
 0x1a3   :  { %6072 = vmatpush3.bf16.msra.mxu0 %v6071_v57 }
 0x1a4   :  { %6073 = vmatprep.subr.bf16.mxu0 %v6243_v12  ;;  %5208 = vmatpush3.msra.mxu1 %v7435_v48 }
 0x1a5   :  { %5210 = vmatmul.mubr.f32.vlgmr.msra.gmra.mrb[0].mxu1 %v7317_v19  ;;  %5860 = vmatprep.subr.bf16.mxu1 %v6243_v12  ;;  %v5876_v19 = vpack.c.bf16 %v1789_v31, %v1782_v9 }
 0x1a6   :  { %5862 = vmatpush3.bf16.msra.mxu1 %v7320_v42  ;;  %5226 = vmatprep.mubr.msk.f32.mxu1 %vm6246_vm1, %v6247_v61 }
 0x1a7   :  { %6075 = vmatpush3.bf16.msra.mxu0 %v6074_v46  ;;  %5863 = vmatprep.subr.bf16.mxu1 %v6243_v12 }
 0x1a8   :  { %5615 = vmatprep.subr.mxu0 %v6247_v61 }
 0x1aa   :  { %5865 = vmatpush3.bf16.msra.mxu1 %v7335_v50 }
 0x1ab   :  { %5616 = vmatpush3.msra.mxu0 %v7468_v3  ;;  %5866 = vmatprep.subr.bf16.mxu1 %v6243_v12 }
 0x1ac   :  { %5618 = vmatmul.mubr.f32.vlgmr.msra.gmra.mrb[0].mxu0 %v7383_v15  ;;  %6076 = vmatprep.subr.bf16.mxu0 %v6243_v12 }
 0x1ad   :  { %6078 = vmatpush3.bf16.msra.mxu0 %v7344_v35  ;;  %5634 = vmatprep.mubr.msk.f32.mxu0 %vm6246_vm1, %v6247_v61 }
 0x1ae   :  { %6079 = vmatprep.subr.bf16.mxu0 %v6243_v12  ;;  %5868 = vmatpush3.bf16.msra.mxu1 %v7358_v51 }
 0x1af   :  { %5224 = vmatprep.subr.mxu1 %v6247_v61 }
 0x1b1   :  { %6081 = vmatpush3.bf16.msra.mxu0 %v7392_v54 }
 0x1b2   :  { %6082 = vmatprep.subr.bf16.mxu0 %v6243_v12  ;;  %5225 = vmatpush3.msra.mxu1 %v7401_v10 }
 0x1b3   :  { %5227 = vmatmul.mubr.f32.vlgmr.msra.gmra.mrb[0].mxu1 %v1743_v38  ;;  %5869 = vmatprep.subr.bf16.mxu1 %v6243_v12 }
 0x1b4   :  { %5871 = vmatpush3.bf16.msra.mxu1 %v5870_v22  ;;  %5243 = vmatprep.mubr.msk.f32.mxu1 %vm6246_vm1, %v6247_v61 }
 0x1b5   :  { %6084 = vmatpush3.bf16.msra.mxu0 %v7437_v33  ;;  %5872 = vmatprep.subr.bf16.mxu1 %v6243_v12 }
 0x1b6   :  { %5632 = vmatprep.subr.mxu0 %v6247_v61 }
 0x1b8   :  { %5874 = vmatpush3.bf16.msra.mxu1 %v5873_v18 }
 0x1b9   :  { %5633 = vmatpush3.msra.mxu0 %v7461_v49  ;;  %5875 = vmatprep.subr.bf16.mxu1 %v6243_v12 }
 0x1ba   :  { %5635 = vmatmul.mubr.f32.vlgmr.msra.gmra.mrb[0].mxu0 %v3923_v55  ;;  %6085 = vmatprep.subr.bf16.mxu0 %v6243_v12 }
 0x1bb   :  { %6087 = vmatpush3.bf16.msra.mxu0 %v6086_v25  ;;  %5651 = vmatprep.mubr.msk.f32.mxu0 %vm6246_vm1, %v6247_v61 }
 0x1bc   :  { %6088 = vmatprep.subr.bf16.mxu0 %v6243_v12  ;;  %5877 = vmatpush3.bf16.msra.mxu1 %v5876_v19 }
 0x1bd   :  { %5241 = vmatprep.subr.mxu1 %v6247_v61 }
 0x1bf   :  { %6090 = vmatpush3.bf16.msra.mxu0 %v6089_v34 }
 0x1c0   :  { %6091 = vmatprep.subr.bf16.mxu0 %v6243_v12  ;;  %5242 = vmatpush3.msra.mxu1 %v1796_v0 }
 0x1c1   :  { %5244 = vmatmul.mubr.msk.f32.vlgmr.msra.gmra.mrb[0].mxu1 %vm42_vm2, %v7277_v62  ;;  %5878 = vmatprep.subr.bf16.mxu1 %v6243_v12 }
 0x1c2   :  { %5880 = vmatpush3.bf16.msra.mxu1 %v7320_v42  ;;  %5260 = vmatprep.mubr.msk.f32.mxu1 %vm6246_vm1, %v6247_v61 }
 0x1c3   :  { %6093 = vmatpush3.bf16.msra.mxu0 %v6092_v24  ;;  %5881 = vmatprep.subr.bf16.mxu1 %v6243_v12 }
 0x1c4   :  { %5649 = vmatprep.subr.mxu0 %v6247_v61 }
 0x1c6   :  { %5883 = vmatpush3.bf16.msra.mxu1 %v7335_v50 }
 0x1c7   :  { %5650 = vmatpush3.msra.mxu0 %v3976_v37  ;;  %5884 = vmatprep.subr.bf16.mxu1 %v6243_v12 }
 0x1c8   :  { %5652 = vmatmul.mubr.msk.f32.vlgmr.msra.gmra.mrb[0].mxu0 %vm42_vm2, %v7324_v20  ;;  %6094 = vmatprep.subr.bf16.mxu0 %v6243_v12 }
 0x1c9   :  { %6096 = vmatpush3.bf16.msra.mxu0 %v7344_v35  ;;  %5668 = vmatprep.mubr.msk.f32.mxu0 %vm6246_vm1, %v6247_v61 }
 0x1ca   :  { %6097 = vmatprep.subr.bf16.mxu0 %v6243_v12  ;;  %5886 = vmatpush3.bf16.msra.mxu1 %v7358_v51 }
 0x1cb   :  { %5258 = vmatprep.subr.mxu1 %v6247_v61 }
 0x1cd   :  { %6099 = vmatpush3.bf16.msra.mxu0 %v7392_v54 }
 0x1ce   :  { %6100 = vmatprep.subr.bf16.mxu0 %v6243_v12  ;;  %5259 = vmatpush3.msra.mxu1 %v7401_v10 }
 0x1cf   :  { %5261 = vmatmul.mubr.msk.f32.vlgmr.msra.gmra.mrb[0].mxu1 %vm42_vm2, %v7277_v62 }
 0x1d1   :  { %6102 = vmatpush3.bf16.msra.mxu0 %v7437_v33 }
 0x1d2   :  { %5666 = vmatprep.subr.mxu0 %v6247_v61 }
 0x1d5   :  { %5667 = vmatpush3.msra.mxu0 %v7461_v49 }
 0x1d6   :  { %5669 = vmatmul.mubr.msk.f32.vlgmr.msra.gmra.mrb[0].mxu0 %vm42_vm2, %v7324_v20 }
 0x2a2   :  { %v2189_v42 = vpop.f32.mrb[0].mxu1 }
 0x2a3   :  { %v5262_v50 = vpop.f32.mrb[1].mxu1 }
 0x2a9   :  { %v4369_v29 = vpop.f32.mrb[0].mxu0 }
 0x2aa   :  { %v6103_v12 = vadd.f32 %v4369_v29, %v2189_v42  ;;  %v5670_v17 = vpop.f32.mrb[1].mxu0 }
 0x2ac   :  { %4375 = vst.msk [vmem:[#allocation2] sm:$0xff] %vm4374_vm11, %v6103_v12 }
 0x2ad   :  { %6228 = shalt.err (!%p6225_p4)
}
 0x2ae   :  { %s6229_s11 = scalar_lea.hbm %s7632_s2, 128 }
 0x2af   :  { %p6230_p5 = scmp.ne.s32.totalorder %s7632_s2, %s6229_s11  ;;  %p6233_p6 = scmp.lt.u32.totalorder %s6229_s11, %s7632_s2 }
 0x2b1   :  { %p6235_p7 = pnand %p6233_p6, %p6230_p5 }
 0x2b3   :  { %6238 = shalt.err (!%p6235_p7)
}
 0x2b4   :  { %4385 = dma.vmem_to_hbm [thread:$0]  %s4383_s7, 128, %s7632_s2, [#allocation3]  }
 0x2b5   :  { %6239 = dma.done.wait [#allocation3], 128  }
 0x2b6   :  { %6240 = vsyncadd [#allocation3], 4294967168 }
 0x2b7   :  { %4389 = vsyncpa [#allocation3], 1 }

</bundles_post_ra>
